<compile_context>
chip_gen: v6e
topology: v6e:2x2x1
jax: 0.10.0
libtpu: 0.0.40
codegen_flags: <defaults>
</compile_context>

<pallas_src>
import functools

import numpy as np
import jax
import jax.numpy as jnp
from jax import lax
from jax.experimental import pallas as pl
from jax.experimental.pallas import tpu as pltpu


# --------------------------------------------------------------------------
# Fused kernel: Q proj -> offset conv -> grid-sample -> K/V proj -> attention
# -> output linear, for one batch element per grid step.
# Layout inside the kernel is channel-major (C, L), matching torch's NCW view.
# --------------------------------------------------------------------------
def _deform_atten_kernel(x_ref, wq_ref, bq_ref, w1_ref, b1_ref, w2_ref, b2_ref,
                         wkv_ref, bkv_ref, rpb_ref, bias_ref, wout_ref, bout_ref,
                         o_ref, *, L, C, Cg, K, pad, n_groups, scale, rng_factor):
    G = n_groups
    Lp = L + 2 * pad                       # input is left-padded by 2*pad zeros
    GL = G * L
    x_lp = x_ref[0]                        # (C, Lp)  f32, cols [2*pad, Lp) = x
    x_cl = x_lp[:, 2 * pad:]               # (C, L)   original features

    # ---- Q projection (1x1 conv) on the padded slab; zero the pad columns so
    # the offset-conv windows see Conv1d's zero padding. Kept in f32 because it
    # feeds the sampling coordinates.
    lane_p = lax.broadcasted_iota(jnp.int32, (1, Lp), 1)
    q_full = jnp.dot(wq_ref[...], x_lp, preferred_element_type=jnp.float32) + bq_ref[...]
    q_lp = jnp.where(lane_p >= 2 * pad, q_full, 0.0)       # (C, Lp)
    q_cl = q_lp[:, 2 * pad:]                               # (C, L)

    # ---- offset path: both conv layers for ALL groups in two matmuls --------
    # im2col layout: col_all[k*Cg + c, g*L + n] = q_lp[g*Cg + c, n + k]
    col_all = jnp.concatenate(
        [jnp.concatenate([q_lp[g * Cg:(g + 1) * Cg, kk:kk + L] for g in range(G)],
                         axis=1)
         for kk in range(K)], axis=0)                      # (K*Cg, G*L)
    acc = jnp.dot(w1_ref[...], col_all,
                  preferred_element_type=jnp.float32) + b1_ref[...]     # (Cg, G*L)

    # Conv1d(Cg, 1, 1, padding=pad): first `pad` outputs per group see only the
    # zero padding -> pure bias.
    b2 = b2_ref[...]                                       # (1, 1)
    body = jnp.dot(w2_ref[...], acc,
                   preferred_element_type=jnp.float32) + b2             # (1, G*L)

    # within-group output position n for every lane of the (1, G*L) row
    lane_l = lax.broadcasted_iota(jnp.int32, (1, L), 1)
    n_pos = jnp.concatenate([lane_l] * G, axis=1)          # (1, G*L)

    off = jnp.where(n_pos < pad, b2, body)
    off = jnp.tanh(off) * rng_factor                       # offset_range_factor

    # grid_sample coordinates (align_corners=False, padding_mode='zeros')
    denom = float(max(L + 2 * pad - 1, 1))                 # normalize_grid length
    vgrid = n_pos.astype(jnp.float32) + off
    vgrid_scaled = 2.0 * vgrid / denom - 1.0
    pix = ((vgrid_scaled + 1.0) * L - 1.0) * 0.5           # (1, G*L) unnormalized
    y0f = jnp.floor(pix)
    frac = pix - y0f
    y0 = y0f.astype(jnp.int32)
    y1 = y0 + 1

    # per-group one-hot bilinear interpolation blocks, stacked -> (G*L_src, L)
    src = lax.broadcasted_iota(jnp.int32, (L, L), 0)       # sampling source idx
    w_blocks = []
    for g in range(G):
        sl = slice(g * L, (g + 1) * L)
        y0g, y1g, fg = y0[:, sl], y1[:, sl], frac[:, sl]
        w_g = jnp.where((src == y0g) & (y0g >= 0) & (y0g <= L - 1), 1.0 - fg,
                        jnp.where((src == y1g) & (y1g >= 0) & (y1g <= L - 1),
                                  fg, 0.0))                # (L_src, L_out)
        w_blocks.append(w_g)
    w_cat = jnp.concatenate(w_blocks, axis=0)              # (G*L, L)

    # block-diagonal replication of x so ALL group sampling is one MXU matmul
    rows = lax.broadcasted_iota(jnp.int32, (C, 1), 0)
    x_blk = jnp.concatenate(
        [jnp.where((rows >= g * Cg) & (rows < (g + 1) * Cg), x_cl, 0.0)
         for g in range(G)], axis=1)                       # (C, G*L)
    xs_cl = jnp.dot(x_blk.astype(jnp.bfloat16), w_cat.astype(jnp.bfloat16),
                    preferred_element_type=jnp.float32)    # (C, L) sampled feats

    # ---- fused K / V projection (wk||wv concatenated on host, bf16) ---------
    kv = jnp.dot(wkv_ref[...], xs_cl.astype(jnp.bfloat16),
                 preferred_element_type=jnp.float32) + bkv_ref[...]     # (2C, L)
    k_cl = kv[:C, :]
    v_cl = kv[C:, :] + rpb_ref[...]                        # + rel.-pos. bias

    # ---- attention: all heads at once with a block-diagonal mask bias -------
    s = lax.dot_general(q_cl.astype(jnp.bfloat16), k_cl.astype(jnp.bfloat16),
                        (((1,), (1,)), ((), ())),          # q @ k^T over L
                        preferred_element_type=jnp.float32)             # (C, C)
    s = s * scale + bias_ref[...]                          # -1e30 off-head
    s = s - jnp.max(s, axis=-1, keepdims=True)
    e = jnp.exp(s)
    attn = e * pl.reciprocal(jnp.sum(e, axis=-1, keepdims=True), approx=True)

    out_cl = jnp.dot(attn.astype(jnp.bfloat16), v_cl.astype(jnp.bfloat16),
                     preferred_element_type=jnp.float32)                # (C, L)

    # ---- output Linear (channel-major: y_cl = Wout @ out + bout) ------------
    y_cl = jnp.dot(wout_ref[...], out_cl.astype(jnp.bfloat16),
                   preferred_element_type=jnp.float32) + bout_ref[...]
    o_ref[0] = y_cl.astype(o_ref.dtype)


# --------------------------------------------------------------------------
# Forward pass wrapper (host glue = weight repacking + boundary layout only).
# --------------------------------------------------------------------------
def deform_atten1d_forward(x, params, *, n_heads, n_groups, kernel):
    B, L, C = x.shape
    G, H = n_groups, n_heads
    Cg, Ch = C // G, C // H
    K = kernel
    pad = K // 2
    Lp = L + 2 * pad
    scale = C ** (-0.5)

    # Input: channel-major + left zero-pad by 2*pad (absorbs both conv pads).
    x_cl = jnp.transpose(x, (0, 2, 1))                     # (B, C, L)
    x_lp = jnp.pad(x_cl, ((0, 0), (0, 0), (2 * pad, 0)))   # (B, C, Lp)

    # Weight repacking (tiny, host-side):
    w1_flat = params['w_off1'].transpose(1, 0, 2).reshape(Cg, K * Cg)   # im2col layout
    wkv = jnp.concatenate([params['wk'], params['wv']], axis=0).astype(jnp.bfloat16)
    bkv = jnp.concatenate([params['bk'], params['bv']], axis=0)[:, None]
    head_id = jnp.arange(C, dtype=jnp.int32) // Ch
    attn_bias = jnp.where(head_id[:, None] == head_id[None, :],
                          0.0, -1e30).astype(jnp.float32)               # (C, C)
    wout_bf = params['wout'].astype(jnp.bfloat16)

    kern = functools.partial(_deform_atten_kernel, L=L, C=C, Cg=Cg, K=K, pad=pad,
                             n_groups=G, scale=scale, rng_factor=float(K))

    def wspec(r, c):
        return pl.BlockSpec((r, c), lambda i: (0, 0))

    y_cl = pl.pallas_call(
        kern,
        out_shape=jax.ShapeDtypeStruct((B, C, L), jnp.float32),
        grid=(B,),
        in_specs=[
            pl.BlockSpec((1, C, Lp), lambda i: (i, 0, 0)),  # x (padded, chan-major)
            wspec(C, C),          # wq
            wspec(C, 1),          # bq
            wspec(Cg, K * Cg),    # w_off1 flattened for im2col
            wspec(Cg, 1),         # b_off1
            wspec(1, Cg),         # w_off2
            wspec(1, 1),          # b_off2
            wspec(2 * C, C),      # wk || wv (bf16)
            wspec(2 * C, 1),      # bk || bv
            wspec(C, L),          # relative position bias table
            wspec(C, C),          # block-diagonal attention bias
            wspec(C, C),          # wout (bf16)
            wspec(C, 1),          # bout
        ],
        out_specs=pl.BlockSpec((1, C, L), lambda i: (i, 0, 0)),
        compiler_params=pltpu.CompilerParams(
            dimension_semantics=("parallel",),
            vmem_limit_bytes=32 * 1024 * 1024),
    )(x_lp, params['wq'], params['bq'][:, None], w1_flat, params['b_off1'][:, None],
      params['w_off2'][None, :], params['b_off2'].reshape(1, 1),
      wkv, bkv, params['rpb'], attn_bias, wout_bf, params['bout'][:, None])

    return jnp.transpose(y_cl, (0, 2, 1))                  # (B, L, C)


# --------------------------------------------------------------------------
# Pure-JAX f32 reference (same math as the PyTorch module) for validation.
# --------------------------------------------------------------------------
def reference_forward(x, params, *, n_heads, n_groups, kernel):
    B, L, C = x.shape
    G, H = n_groups, n_heads
    Cg, Ch = C // G, C // H
    K = kernel
    pad = K // 2
    hp = lax.Precision.HIGHEST
    xt = jnp.transpose(x, (0, 2, 1))

    def conv1x1(t, w, b):
        return jnp.einsum('oc,bcl->bol', w, t, precision=hp) + b[None, :, None]

    q = conv1x1(xt, params['wq'], params['bq'])
    gq = q.reshape(B * G, Cg, L)
    gq_p = jnp.pad(gq, ((0, 0), (0, 0), (pad, pad)))
    conv1 = jnp.zeros((B * G, Cg, L))
    for kk in range(K):
        conv1 = conv1 + jnp.einsum('oc,bcl->bol', params['w_off1'][kk],
                                   gq_p[:, :, kk:kk + L], precision=hp)
    conv1 = conv1 + params['b_off1'][None, :, None]
    body = jnp.einsum('c,bcl->bl', params['w_off2'], conv1, precision=hp) + params['b_off2']
    bias_cols = jnp.full((B * G, pad), params['b_off2'][0])
    off_full = jnp.concatenate([bias_cols, body, bias_cols], axis=1)   # (BG, L+2*pad)
    off_full = jnp.tanh(off_full) * float(K)
    n_len = L + 2 * pad
    vgrid = jnp.arange(n_len, dtype=jnp.float32)[None, :] + off_full
    vgrid_scaled = 2.0 * vgrid / max(n_len - 1, 1) - 1.0
    pixel = ((vgrid_scaled + 1.0) * L - 1.0) / 2.0
    gx = xt.reshape(B * G, Cg, L)
    y0f = jnp.floor(pixel)
    frac = pixel - y0f
    y0 = y0f.astype(jnp.int32)
    y1 = y0 + 1

    def take(idx):
        idxc = jnp.clip(idx, 0, L - 1)
        idxb = jnp.broadcast_to(idxc[:, None, :], (B * G, Cg, n_len))
        return jnp.take_along_axis(gx, idxb, axis=2)

    m0 = ((y0 >= 0) & (y0 <= L - 1)).astype(jnp.float32)
    m1 = ((y1 >= 0) & (y1 <= L - 1)).astype(jnp.float32)
    xs_full = take(y0) * ((1.0 - frac) * m0)[:, None, :] + take(y1) * (frac * m1)[:, None, :]
    xs = xs_full[:, :, :L].reshape(B, C, L)
    k = conv1x1(xs, params['wk'], params['bk'])
    v = conv1x1(xs, params['wv'], params['bv']) + params['rpb'][None]
    qh = q.reshape(B * H, Ch, L)
    kh = k.reshape(B * H, Ch, L)
    vh = v.reshape(B * H, Ch, L)
    s = jnp.einsum('bil,bjl->bij', qh, kh, precision=hp) * (C ** -0.5)
    attn = jax.nn.softmax(s, axis=-1)
    out = jnp.einsum('bij,bjl->bil', attn, vh, precision=hp)
    out_r = out.reshape(B, H, Ch, L).transpose(0, 3, 1, 2).reshape(B, L, C)
    return jnp.einsum('blc,oc->blo', out_r, params['wout'], precision=hp) + params['bout'][None, None, :]


# --------------------------------------------------------------------------
# Deterministic parameter init (synthetic; shapes follow the module __init__).
# --------------------------------------------------------------------------
def init_params(key, *, seq_len, d_model, n_groups, kernel):
    Cg = d_model // n_groups
    ks = jax.random.split(key, 13)

    def nrm(k, shape, s):
        return jax.random.normal(k, shape, jnp.float32) * s

    return dict(
        wq=nrm(ks[0], (d_model, d_model), 0.1), bq=nrm(ks[1], (d_model,), 0.05),
        wk=nrm(ks[2], (d_model, d_model), 0.1), bk=nrm(ks[3], (d_model,), 0.05),
        wv=nrm(ks[4], (d_model, d_model), 0.1), bv=nrm(ks[5], (d_model,), 0.05),
        w_off1=nrm(ks[6], (kernel, Cg, Cg), 0.1), b_off1=nrm(ks[7], (Cg,), 0.05),
        w_off2=nrm(ks[8], (Cg,), 0.1), b_off2=nrm(ks[9], (1,), 0.05),
        wout=nrm(ks[10], (d_model, d_model), 0.1), bout=nrm(ks[11], (d_model,), 0.05),
        rpb=nrm(ks[12], (d_model, seq_len), 0.02),   # relative_position_bias_table
    )
    # TODO(synk): dropout / the optional mask arg / the no_off=True avg_pool
    # branch are unused by the module's default forward; not implemented.


if __name__ == "__main__":
    B, L, C, H, G, K = 2, 16, 32, 8, 4, 5      # seq_len=16, d_model=32, heads=8, groups=4
    key = jax.random.PRNGKey(0)
    pkey, xkey = jax.random.split(key)
    params = init_params(pkey, seq_len=L, d_model=C, n_groups=G, kernel=K)
    x = jax.random.normal(xkey, (B, L, C), jnp.float32)

    y = deform_atten1d_forward(x, params, n_heads=H, n_groups=G, kernel=K)
    y = jax.block_until_ready(y)
    assert y.shape == (B, L, C)

    y_ref = jax.block_until_ready(
        reference_forward(x, params, n_heads=H, n_groups=G, kernel=K))
    np.testing.assert_allclose(np.asarray(y), np.asarray(y_ref), atol=5e-2, rtol=5e-2)

    print("KERNEL_OK")
</pallas_src>

<mosaic_0001>
module attributes {stable_mosaic.version = 11 : i64} {
  func.func @_deform_atten_kernel(%arg0: i32, %arg1: memref<1x32x20xf32, #tpu.memory_space<vmem>>, %arg2: memref<32x32xf32, #tpu.memory_space<vmem>>, %arg3: memref<32x1xf32, #tpu.memory_space<vmem>>, %arg4: memref<8x40xf32, #tpu.memory_space<vmem>>, %arg5: memref<8x1xf32, #tpu.memory_space<vmem>>, %arg6: memref<1x8xf32, #tpu.memory_space<vmem>>, %arg7: memref<1x1xf32, #tpu.memory_space<vmem>>, %arg8: memref<64x32xbf16, #tpu.memory_space<vmem>>, %arg9: memref<64x1xf32, #tpu.memory_space<vmem>>, %arg10: memref<32x16xf32, #tpu.memory_space<vmem>>, %arg11: memref<32x32xf32, #tpu.memory_space<vmem>>, %arg12: memref<32x32xbf16, #tpu.memory_space<vmem>>, %arg13: memref<32x1xf32, #tpu.memory_space<vmem>>, %arg14: memref<1x32x16xf32, #tpu.memory_space<vmem>>) attributes {dimension_semantics = [#tpu.dimension_semantics<parallel>], iteration_bounds = array<i64: 2>, scalar_prefetch = 0 : i64, scratch_operands = 0 : i64, tpu.core_type = #tpu.core_type<tc>, window_params = [{transform_indices = @transform_0, window_bounds = array<i64: 1, 32, 20>}, {pipeline_mode = #tpu.pipeline_mode<synchronous>, transform_indices = @transform_1, window_bounds = array<i64: 32, 32>}, {pipeline_mode = #tpu.pipeline_mode<synchronous>, transform_indices = @transform_2, window_bounds = array<i64: 32, 1>}, {pipeline_mode = #tpu.pipeline_mode<synchronous>, transform_indices = @transform_3, window_bounds = array<i64: 8, 40>}, {pipeline_mode = #tpu.pipeline_mode<synchronous>, transform_indices = @transform_4, window_bounds = array<i64: 8, 1>}, {pipeline_mode = #tpu.pipeline_mode<synchronous>, transform_indices = @transform_5, window_bounds = array<i64: 1, 8>}, {pipeline_mode = #tpu.pipeline_mode<synchronous>, transform_indices = @transform_6, window_bounds = array<i64: 1, 1>}, {pipeline_mode = #tpu.pipeline_mode<synchronous>, transform_indices = @transform_7, window_bounds = array<i64: 64, 32>}, {pipeline_mode = #tpu.pipeline_mode<synchronous>, transform_indices = @transform_8, window_bounds = array<i64: 64, 1>}, {pipeline_mode = #tpu.pipeline_mode<synchronous>, transform_indices = @transform_9, window_bounds = array<i64: 32, 16>}, {pipeline_mode = #tpu.pipeline_mode<synchronous>, transform_indices = @transform_10, window_bounds = array<i64: 32, 32>}, {pipeline_mode = #tpu.pipeline_mode<synchronous>, transform_indices = @transform_11, window_bounds = array<i64: 32, 32>}, {pipeline_mode = #tpu.pipeline_mode<synchronous>, transform_indices = @transform_12, window_bounds = array<i64: 32, 1>}, {transform_indices = @transform_13, window_bounds = array<i64: 1, 32, 16>}]} {
    %c0 = arith.constant 0 : index
    %c0_0 = arith.constant 0 : index
    %c0_1 = arith.constant 0 : index
    %0 = vector.load %arg1[%c0, %c0_0, %c0_1] : memref<1x32x20xf32, #tpu.memory_space<vmem>>, vector<1x32x20xf32>
    %1 = vector.shape_cast %0 : vector<1x32x20xf32> to vector<32x20xf32>
    %2 = vector.extract_strided_slice %1 {offsets = [0, 4], sizes = [32, 16], strides = [1, 1]} : vector<32x20xf32> to vector<32x16xf32>
    %3 = tpu.iota {dimensions = array<i32: 1>} : vector<1x20xi32>
    %c0_2 = arith.constant 0 : index
    %c0_3 = arith.constant 0 : index
    %4 = vector.load %arg2[%c0_2, %c0_3] : memref<32x32xf32, #tpu.memory_space<vmem>>, vector<32x32xf32>
    %cst = arith.constant dense<0.000000e+00> : vector<32x20xf32>
    %5 = tpu.matmul %4, %1, %cst {dimension_numbers = #tpu.dot_dimension_numbers<[1], [0], [0], [1], [0, 0, 1, 1], [], []>} : vector<32x32xf32>, vector<32x20xf32>, vector<32x20xf32> -> vector<32x20xf32>
    %c0_4 = arith.constant 0 : index
    %c0_5 = arith.constant 0 : index
    %6 = vector.load %arg3[%c0_4, %c0_5] : memref<32x1xf32, #tpu.memory_space<vmem>>, vector<32x1xf32>
    %7 = vector.broadcast %6 : vector<32x1xf32> to vector<32x20xf32>
    %8 = arith.addf %5, %7 : vector<32x20xf32>
    %c4_i32 = arith.constant 4 : i32
    %9 = vector.broadcast %c4_i32 : i32 to vector<1x20xi32>
    %10 = arith.cmpi sge, %3, %9 : vector<1x20xi32>
    %cst_6 = arith.constant 0.000000e+00 : f32
    %11 = vector.shape_cast %10 : vector<1x20xi1> to vector<1x20xi1>
    %12 = vector.broadcast %11 : vector<1x20xi1> to vector<32x20xi1>
    %13 = vector.broadcast %cst_6 : f32 to vector<32x20xf32>
    %14 = arith.select %12, %8, %13 : vector<32x20xi1>, vector<32x20xf32>
    %15 = vector.extract_strided_slice %14 {offsets = [0, 4], sizes = [32, 16], strides = [1, 1]} : vector<32x20xf32> to vector<32x16xf32>
    %16 = vector.extract_strided_slice %14 {offsets = [0, 0], sizes = [8, 16], strides = [1, 1]} : vector<32x20xf32> to vector<8x16xf32>
    %17 = vector.extract_strided_slice %14 {offsets = [8, 0], sizes = [8, 16], strides = [1, 1]} : vector<32x20xf32> to vector<8x16xf32>
    %18 = vector.extract_strided_slice %14 {offsets = [16, 0], sizes = [8, 16], strides = [1, 1]} : vector<32x20xf32> to vector<8x16xf32>
    %19 = vector.extract_strided_slice %14 {offsets = [24, 0], sizes = [8, 16], strides = [1, 1]} : vector<32x20xf32> to vector<8x16xf32>
    %20 = tpu.concatenate %16, %17, %18, %19 in 1 : vector<8x16xf32>, vector<8x16xf32>, vector<8x16xf32>, vector<8x16xf32> -> vector<8x64xf32>
    %21 = vector.extract_strided_slice %14 {offsets = [0, 1], sizes = [8, 16], strides = [1, 1]} : vector<32x20xf32> to vector<8x16xf32>
    %22 = vector.extract_strided_slice %14 {offsets = [8, 1], sizes = [8, 16], strides = [1, 1]} : vector<32x20xf32> to vector<8x16xf32>
    %23 = vector.extract_strided_slice %14 {offsets = [16, 1], sizes = [8, 16], strides = [1, 1]} : vector<32x20xf32> to vector<8x16xf32>
    %24 = vector.extract_strided_slice %14 {offsets = [24, 1], sizes = [8, 16], strides = [1, 1]} : vector<32x20xf32> to vector<8x16xf32>
    %25 = tpu.concatenate %21, %22, %23, %24 in 1 : vector<8x16xf32>, vector<8x16xf32>, vector<8x16xf32>, vector<8x16xf32> -> vector<8x64xf32>
    %26 = vector.extract_strided_slice %14 {offsets = [0, 2], sizes = [8, 16], strides = [1, 1]} : vector<32x20xf32> to vector<8x16xf32>
    %27 = vector.extract_strided_slice %14 {offsets = [8, 2], sizes = [8, 16], strides = [1, 1]} : vector<32x20xf32> to vector<8x16xf32>
    %28 = vector.extract_strided_slice %14 {offsets = [16, 2], sizes = [8, 16], strides = [1, 1]} : vector<32x20xf32> to vector<8x16xf32>
    %29 = vector.extract_strided_slice %14 {offsets = [24, 2], sizes = [8, 16], strides = [1, 1]} : vector<32x20xf32> to vector<8x16xf32>
    %30 = tpu.concatenate %26, %27, %28, %29 in 1 : vector<8x16xf32>, vector<8x16xf32>, vector<8x16xf32>, vector<8x16xf32> -> vector<8x64xf32>
    %31 = vector.extract_strided_slice %14 {offsets = [0, 3], sizes = [8, 16], strides = [1, 1]} : vector<32x20xf32> to vector<8x16xf32>
    %32 = vector.extract_strided_slice %14 {offsets = [8, 3], sizes = [8, 16], strides = [1, 1]} : vector<32x20xf32> to vector<8x16xf32>
    %33 = vector.extract_strided_slice %14 {offsets = [16, 3], sizes = [8, 16], strides = [1, 1]} : vector<32x20xf32> to vector<8x16xf32>
    %34 = vector.extract_strided_slice %14 {offsets = [24, 3], sizes = [8, 16], strides = [1, 1]} : vector<32x20xf32> to vector<8x16xf32>
    %35 = tpu.concatenate %31, %32, %33, %34 in 1 : vector<8x16xf32>, vector<8x16xf32>, vector<8x16xf32>, vector<8x16xf32> -> vector<8x64xf32>
    %36 = vector.extract_strided_slice %14 {offsets = [0, 4], sizes = [8, 16], strides = [1, 1]} : vector<32x20xf32> to vector<8x16xf32>
    %37 = vector.extract_strided_slice %14 {offsets = [8, 4], sizes = [8, 16], strides = [1, 1]} : vector<32x20xf32> to vector<8x16xf32>
    %38 = vector.extract_strided_slice %14 {offsets = [16, 4], sizes = [8, 16], strides = [1, 1]} : vector<32x20xf32> to vector<8x16xf32>
    %39 = vector.extract_strided_slice %14 {offsets = [24, 4], sizes = [8, 16], strides = [1, 1]} : vector<32x20xf32> to vector<8x16xf32>
    %40 = tpu.concatenate %36, %37, %38, %39 in 1 : vector<8x16xf32>, vector<8x16xf32>, vector<8x16xf32>, vector<8x16xf32> -> vector<8x64xf32>
    %41 = tpu.concatenate %20, %25, %30, %35, %40 in 0 : vector<8x64xf32>, vector<8x64xf32>, vector<8x64xf32>, vector<8x64xf32>, vector<8x64xf32> -> vector<40x64xf32>
    %c0_7 = arith.constant 0 : index
    %c0_8 = arith.constant 0 : index
    %42 = vector.load %arg4[%c0_7, %c0_8] : memref<8x40xf32, #tpu.memory_space<vmem>>, vector<8x40xf32>
    %cst_9 = arith.constant dense<0.000000e+00> : vector<8x64xf32>
    %43 = tpu.matmul %42, %41, %cst_9 {dimension_numbers = #tpu.dot_dimension_numbers<[1], [0], [0], [1], [0, 0, 1, 1], [], []>} : vector<8x40xf32>, vector<40x64xf32>, vector<8x64xf32> -> vector<8x64xf32>
    %c0_10 = arith.constant 0 : index
    %c0_11 = arith.constant 0 : index
    %44 = vector.load %arg5[%c0_10, %c0_11] : memref<8x1xf32, #tpu.memory_space<vmem>>, vector<8x1xf32>
    %45 = vector.broadcast %44 : vector<8x1xf32> to vector<8x64xf32>
    %46 = arith.addf %43, %45 : vector<8x64xf32>
    %c0_12 = arith.constant 0 : index
    %c0_13 = arith.constant 0 : index
    %47 = vector.load %arg7[%c0_12, %c0_13] : memref<1x1xf32, #tpu.memory_space<vmem>>, vector<1x1xf32>
    %c0_14 = arith.constant 0 : index
    %c0_15 = arith.constant 0 : index
    %48 = vector.load %arg6[%c0_14, %c0_15] : memref<1x8xf32, #tpu.memory_space<vmem>>, vector<1x8xf32>
    %cst_16 = arith.constant dense<0.000000e+00> : vector<1x64xf32>
    %49 = tpu.matmul %48, %46, %cst_16 {dimension_numbers = #tpu.dot_dimension_numbers<[1], [0], [0], [1], [0, 0, 1, 1], [], []>} : vector<1x8xf32>, vector<8x64xf32>, vector<1x64xf32> -> vector<1x64xf32>
    %50 = vector.broadcast %47 : vector<1x1xf32> to vector<1x64xf32>
    %51 = arith.addf %49, %50 : vector<1x64xf32>
    %52 = tpu.iota {dimensions = array<i32: 1>} : vector<1x16xi32>
    %53 = tpu.concatenate %52, %52, %52, %52 in 1 : vector<1x16xi32>, vector<1x16xi32>, vector<1x16xi32>, vector<1x16xi32> -> vector<1x64xi32>
    %c2_i32 = arith.constant 2 : i32
    %54 = vector.broadcast %c2_i32 : i32 to vector<1x64xi32>
    %55 = arith.cmpi slt, %53, %54 : vector<1x64xi32>
    %56 = vector.shape_cast %47 : vector<1x1xf32> to vector<1x1xf32>
    %57 = vector.broadcast %56 : vector<1x1xf32> to vector<1x64xf32>
    %58 = arith.select %55, %57, %51 : vector<1x64xi1>, vector<1x64xf32>
    %59 = math.tanh %58 : vector<1x64xf32>
    %cst_17 = arith.constant 5.000000e+00 : f32
    %60 = vector.broadcast %cst_17 : f32 to vector<1x64xf32>
    %61 = arith.mulf %59, %60 : vector<1x64xf32>
    %62 = arith.sitofp %53 : vector<1x64xi32> to vector<1x64xf32>
    %63 = arith.addf %62, %61 : vector<1x64xf32>
    %cst_18 = arith.constant 2.000000e+00 : f32
    %64 = vector.broadcast %cst_18 : f32 to vector<1x64xf32>
    %65 = arith.mulf %64, %63 : vector<1x64xf32>
    %cst_19 = arith.constant 1.900000e+01 : f32
    %66 = vector.broadcast %cst_19 : f32 to vector<1x64xf32>
    %67 = arith.divf %65, %66 : vector<1x64xf32>
    %cst_20 = arith.constant 1.000000e+00 : f32
    %68 = vector.broadcast %cst_20 : f32 to vector<1x64xf32>
    %69 = arith.subf %67, %68 : vector<1x64xf32>
    %cst_21 = arith.constant 1.000000e+00 : f32
    %70 = vector.broadcast %cst_21 : f32 to vector<1x64xf32>
    %71 = arith.addf %69, %70 : vector<1x64xf32>
    %cst_22 = arith.constant 1.600000e+01 : f32
    %72 = vector.broadcast %cst_22 : f32 to vector<1x64xf32>
    %73 = arith.mulf %71, %72 : vector<1x64xf32>
    %cst_23 = arith.constant 1.000000e+00 : f32
    %74 = vector.broadcast %cst_23 : f32 to vector<1x64xf32>
    %75 = arith.subf %73, %74 : vector<1x64xf32>
    %cst_24 = arith.constant 5.000000e-01 : f32
    %76 = vector.broadcast %cst_24 : f32 to vector<1x64xf32>
    %77 = arith.mulf %75, %76 : vector<1x64xf32>
    %78 = math.floor %77 : vector<1x64xf32>
    %79 = arith.subf %77, %78 : vector<1x64xf32>
    %80 = arith.fptosi %78 : vector<1x64xf32> to vector<1x64xi32>
    %c1_i32 = arith.constant 1 : i32
    %81 = vector.broadcast %c1_i32 : i32 to vector<1x64xi32>
    %82 = arith.addi %80, %81 : vector<1x64xi32>
    %83 = tpu.iota {dimensions = array<i32: 0>} : vector<16x16xi32>
    %84 = vector.extract_strided_slice %80 {offsets = [0, 0], sizes = [1, 16], strides = [1, 1]} : vector<1x64xi32> to vector<1x16xi32>
    %85 = vector.extract_strided_slice %82 {offsets = [0, 0], sizes = [1, 16], strides = [1, 1]} : vector<1x64xi32> to vector<1x16xi32>
    %86 = vector.extract_strided_slice %79 {offsets = [0, 0], sizes = [1, 16], strides = [1, 1]} : vector<1x64xf32> to vector<1x16xf32>
    %87 = vector.broadcast %84 : vector<1x16xi32> to vector<16x16xi32>
    %88 = arith.cmpi eq, %83, %87 : vector<16x16xi32>
    %c0_i32 = arith.constant 0 : i32
    %89 = vector.broadcast %c0_i32 : i32 to vector<1x16xi32>
    %90 = arith.cmpi sge, %84, %89 : vector<1x16xi32>
    %91 = vector.broadcast %90 : vector<1x16xi1> to vector<16x16xi1>
    %92 = arith.andi %88, %91 : vector<16x16xi1>
    %c15_i32 = arith.constant 15 : i32
    %93 = vector.broadcast %c15_i32 : i32 to vector<1x16xi32>
    %94 = arith.cmpi sle, %84, %93 : vector<1x16xi32>
    %95 = vector.broadcast %94 : vector<1x16xi1> to vector<16x16xi1>
    %96 = arith.andi %92, %95 : vector<16x16xi1>
    %cst_25 = arith.constant 1.000000e+00 : f32
    %97 = vector.broadcast %cst_25 : f32 to vector<1x16xf32>
    %98 = arith.subf %97, %86 : vector<1x16xf32>
    %99 = vector.broadcast %85 : vector<1x16xi32> to vector<16x16xi32>
    %100 = arith.cmpi eq, %83, %99 : vector<16x16xi32>
    %c0_i32_26 = arith.constant 0 : i32
    %101 = vector.broadcast %c0_i32_26 : i32 to vector<1x16xi32>
    %102 = arith.cmpi sge, %85, %101 : vector<1x16xi32>
    %103 = vector.broadcast %102 : vector<1x16xi1> to vector<16x16xi1>
    %104 = arith.andi %100, %103 : vector<16x16xi1>
    %c15_i32_27 = arith.constant 15 : i32
    %105 = vector.broadcast %c15_i32_27 : i32 to vector<1x16xi32>
    %106 = arith.cmpi sle, %85, %105 : vector<1x16xi32>
    %107 = vector.broadcast %106 : vector<1x16xi1> to vector<16x16xi1>
    %108 = arith.andi %104, %107 : vector<16x16xi1>
    %cst_28 = arith.constant 0.000000e+00 : f32
    %109 = vector.shape_cast %86 : vector<1x16xf32> to vector<1x16xf32>
    %110 = vector.broadcast %109 : vector<1x16xf32> to vector<16x16xf32>
    %111 = vector.broadcast %cst_28 : f32 to vector<16x16xf32>
    %112 = arith.select %108, %110, %111 : vector<16x16xi1>, vector<16x16xf32>
    %113 = vector.shape_cast %98 : vector<1x16xf32> to vector<1x16xf32>
    %114 = vector.broadcast %113 : vector<1x16xf32> to vector<16x16xf32>
    %115 = arith.select %96, %114, %112 : vector<16x16xi1>, vector<16x16xf32>
    %116 = vector.extract_strided_slice %80 {offsets = [0, 16], sizes = [1, 16], strides = [1, 1]} : vector<1x64xi32> to vector<1x16xi32>
    %117 = vector.extract_strided_slice %82 {offsets = [0, 16], sizes = [1, 16], strides = [1, 1]} : vector<1x64xi32> to vector<1x16xi32>
    %118 = vector.extract_strided_slice %79 {offsets = [0, 16], sizes = [1, 16], strides = [1, 1]} : vector<1x64xf32> to vector<1x16xf32>
    %119 = vector.broadcast %116 : vector<1x16xi32> to vector<16x16xi32>
    %120 = arith.cmpi eq, %83, %119 : vector<16x16xi32>
    %c0_i32_29 = arith.constant 0 : i32
    %121 = vector.broadcast %c0_i32_29 : i32 to vector<1x16xi32>
    %122 = arith.cmpi sge, %116, %121 : vector<1x16xi32>
    %123 = vector.broadcast %122 : vector<1x16xi1> to vector<16x16xi1>
    %124 = arith.andi %120, %123 : vector<16x16xi1>
    %c15_i32_30 = arith.constant 15 : i32
    %125 = vector.broadcast %c15_i32_30 : i32 to vector<1x16xi32>
    %126 = arith.cmpi sle, %116, %125 : vector<1x16xi32>
    %127 = vector.broadcast %126 : vector<1x16xi1> to vector<16x16xi1>
    %128 = arith.andi %124, %127 : vector<16x16xi1>
    %cst_31 = arith.constant 1.000000e+00 : f32
    %129 = vector.broadcast %cst_31 : f32 to vector<1x16xf32>
    %130 = arith.subf %129, %118 : vector<1x16xf32>
    %131 = vector.broadcast %117 : vector<1x16xi32> to vector<16x16xi32>
    %132 = arith.cmpi eq, %83, %131 : vector<16x16xi32>
    %c0_i32_32 = arith.constant 0 : i32
    %133 = vector.broadcast %c0_i32_32 : i32 to vector<1x16xi32>
    %134 = arith.cmpi sge, %117, %133 : vector<1x16xi32>
    %135 = vector.broadcast %134 : vector<1x16xi1> to vector<16x16xi1>
    %136 = arith.andi %132, %135 : vector<16x16xi1>
    %c15_i32_33 = arith.constant 15 : i32
    %137 = vector.broadcast %c15_i32_33 : i32 to vector<1x16xi32>
    %138 = arith.cmpi sle, %117, %137 : vector<1x16xi32>
    %139 = vector.broadcast %138 : vector<1x16xi1> to vector<16x16xi1>
    %140 = arith.andi %136, %139 : vector<16x16xi1>
    %cst_34 = arith.constant 0.000000e+00 : f32
    %141 = vector.shape_cast %118 : vector<1x16xf32> to vector<1x16xf32>
    %142 = vector.broadcast %141 : vector<1x16xf32> to vector<16x16xf32>
    %143 = vector.broadcast %cst_34 : f32 to vector<16x16xf32>
    %144 = arith.select %140, %142, %143 : vector<16x16xi1>, vector<16x16xf32>
    %145 = vector.shape_cast %130 : vector<1x16xf32> to vector<1x16xf32>
    %146 = vector.broadcast %145 : vector<1x16xf32> to vector<16x16xf32>
    %147 = arith.select %128, %146, %144 : vector<16x16xi1>, vector<16x16xf32>
    %148 = vector.extract_strided_slice %80 {offsets = [0, 32], sizes = [1, 16], strides = [1, 1]} : vector<1x64xi32> to vector<1x16xi32>
    %149 = vector.extract_strided_slice %82 {offsets = [0, 32], sizes = [1, 16], strides = [1, 1]} : vector<1x64xi32> to vector<1x16xi32>
    %150 = vector.extract_strided_slice %79 {offsets = [0, 32], sizes = [1, 16], strides = [1, 1]} : vector<1x64xf32> to vector<1x16xf32>
    %151 = vector.broadcast %148 : vector<1x16xi32> to vector<16x16xi32>
    %152 = arith.cmpi eq, %83, %151 : vector<16x16xi32>
    %c0_i32_35 = arith.constant 0 : i32
    %153 = vector.broadcast %c0_i32_35 : i32 to vector<1x16xi32>
    %154 = arith.cmpi sge, %148, %153 : vector<1x16xi32>
    %155 = vector.broadcast %154 : vector<1x16xi1> to vector<16x16xi1>
    %156 = arith.andi %152, %155 : vector<16x16xi1>
    %c15_i32_36 = arith.constant 15 : i32
    %157 = vector.broadcast %c15_i32_36 : i32 to vector<1x16xi32>
    %158 = arith.cmpi sle, %148, %157 : vector<1x16xi32>
    %159 = vector.broadcast %158 : vector<1x16xi1> to vector<16x16xi1>
    %160 = arith.andi %156, %159 : vector<16x16xi1>
    %cst_37 = arith.constant 1.000000e+00 : f32
    %161 = vector.broadcast %cst_37 : f32 to vector<1x16xf32>
    %162 = arith.subf %161, %150 : vector<1x16xf32>
    %163 = vector.broadcast %149 : vector<1x16xi32> to vector<16x16xi32>
    %164 = arith.cmpi eq, %83, %163 : vector<16x16xi32>
    %c0_i32_38 = arith.constant 0 : i32
    %165 = vector.broadcast %c0_i32_38 : i32 to vector<1x16xi32>
    %166 = arith.cmpi sge, %149, %165 : vector<1x16xi32>
    %167 = vector.broadcast %166 : vector<1x16xi1> to vector<16x16xi1>
    %168 = arith.andi %164, %167 : vector<16x16xi1>
    %c15_i32_39 = arith.constant 15 : i32
    %169 = vector.broadcast %c15_i32_39 : i32 to vector<1x16xi32>
    %170 = arith.cmpi sle, %149, %169 : vector<1x16xi32>
    %171 = vector.broadcast %170 : vector<1x16xi1> to vector<16x16xi1>
    %172 = arith.andi %168, %171 : vector<16x16xi1>
    %cst_40 = arith.constant 0.000000e+00 : f32
    %173 = vector.shape_cast %150 : vector<1x16xf32> to vector<1x16xf32>
    %174 = vector.broadcast %173 : vector<1x16xf32> to vector<16x16xf32>
    %175 = vector.broadcast %cst_40 : f32 to vector<16x16xf32>
    %176 = arith.select %172, %174, %175 : vector<16x16xi1>, vector<16x16xf32>
    %177 = vector.shape_cast %162 : vector<1x16xf32> to vector<1x16xf32>
    %178 = vector.broadcast %177 : vector<1x16xf32> to vector<16x16xf32>
    %179 = arith.select %160, %178, %176 : vector<16x16xi1>, vector<16x16xf32>
    %180 = vector.extract_strided_slice %80 {offsets = [0, 48], sizes = [1, 16], strides = [1, 1]} : vector<1x64xi32> to vector<1x16xi32>
    %181 = vector.extract_strided_slice %82 {offsets = [0, 48], sizes = [1, 16], strides = [1, 1]} : vector<1x64xi32> to vector<1x16xi32>
    %182 = vector.extract_strided_slice %79 {offsets = [0, 48], sizes = [1, 16], strides = [1, 1]} : vector<1x64xf32> to vector<1x16xf32>
    %183 = vector.broadcast %180 : vector<1x16xi32> to vector<16x16xi32>
    %184 = arith.cmpi eq, %83, %183 : vector<16x16xi32>
    %c0_i32_41 = arith.constant 0 : i32
    %185 = vector.broadcast %c0_i32_41 : i32 to vector<1x16xi32>
    %186 = arith.cmpi sge, %180, %185 : vector<1x16xi32>
    %187 = vector.broadcast %186 : vector<1x16xi1> to vector<16x16xi1>
    %188 = arith.andi %184, %187 : vector<16x16xi1>
    %c15_i32_42 = arith.constant 15 : i32
    %189 = vector.broadcast %c15_i32_42 : i32 to vector<1x16xi32>
    %190 = arith.cmpi sle, %180, %189 : vector<1x16xi32>
    %191 = vector.broadcast %190 : vector<1x16xi1> to vector<16x16xi1>
    %192 = arith.andi %188, %191 : vector<16x16xi1>
    %cst_43 = arith.constant 1.000000e+00 : f32
    %193 = vector.broadcast %cst_43 : f32 to vector<1x16xf32>
    %194 = arith.subf %193, %182 : vector<1x16xf32>
    %195 = vector.broadcast %181 : vector<1x16xi32> to vector<16x16xi32>
    %196 = arith.cmpi eq, %83, %195 : vector<16x16xi32>
    %c0_i32_44 = arith.constant 0 : i32
    %197 = vector.broadcast %c0_i32_44 : i32 to vector<1x16xi32>
    %198 = arith.cmpi sge, %181, %197 : vector<1x16xi32>
    %199 = vector.broadcast %198 : vector<1x16xi1> to vector<16x16xi1>
    %200 = arith.andi %196, %199 : vector<16x16xi1>
    %c15_i32_45 = arith.constant 15 : i32
    %201 = vector.broadcast %c15_i32_45 : i32 to vector<1x16xi32>
    %202 = arith.cmpi sle, %181, %201 : vector<1x16xi32>
    %203 = vector.broadcast %202 : vector<1x16xi1> to vector<16x16xi1>
    %204 = arith.andi %200, %203 : vector<16x16xi1>
    %cst_46 = arith.constant 0.000000e+00 : f32
    %205 = vector.shape_cast %182 : vector<1x16xf32> to vector<1x16xf32>
    %206 = vector.broadcast %205 : vector<1x16xf32> to vector<16x16xf32>
    %207 = vector.broadcast %cst_46 : f32 to vector<16x16xf32>
    %208 = arith.select %204, %206, %207 : vector<16x16xi1>, vector<16x16xf32>
    %209 = vector.shape_cast %194 : vector<1x16xf32> to vector<1x16xf32>
    %210 = vector.broadcast %209 : vector<1x16xf32> to vector<16x16xf32>
    %211 = arith.select %192, %210, %208 : vector<16x16xi1>, vector<16x16xf32>
    %212 = tpu.concatenate %115, %147, %179, %211 in 0 : vector<16x16xf32>, vector<16x16xf32>, vector<16x16xf32>, vector<16x16xf32> -> vector<64x16xf32>
    %213 = tpu.iota {dimensions = array<i32: 0>} : vector<32x1xi32>
    %c0_i32_47 = arith.constant 0 : i32
    %214 = vector.broadcast %c0_i32_47 : i32 to vector<32x1xi32>
    %215 = arith.cmpi sge, %213, %214 : vector<32x1xi32>
    %c8_i32 = arith.constant 8 : i32
    %216 = vector.broadcast %c8_i32 : i32 to vector<32x1xi32>
    %217 = arith.cmpi slt, %213, %216 : vector<32x1xi32>
    %218 = arith.andi %215, %217 : vector<32x1xi1>
    %cst_48 = arith.constant 0.000000e+00 : f32
    %219 = vector.shape_cast %218 : vector<32x1xi1> to vector<32x1xi1>
    %220 = vector.broadcast %219 : vector<32x1xi1> to vector<32x16xi1>
    %221 = vector.broadcast %cst_48 : f32 to vector<32x16xf32>
    %222 = arith.select %220, %2, %221 : vector<32x16xi1>, vector<32x16xf32>
    %c8_i32_49 = arith.constant 8 : i32
    %223 = vector.broadcast %c8_i32_49 : i32 to vector<32x1xi32>
    %224 = arith.cmpi sge, %213, %223 : vector<32x1xi32>
    %c16_i32 = arith.constant 16 : i32
    %225 = vector.broadcast %c16_i32 : i32 to vector<32x1xi32>
    %226 = arith.cmpi slt, %213, %225 : vector<32x1xi32>
    %227 = arith.andi %224, %226 : vector<32x1xi1>
    %cst_50 = arith.constant 0.000000e+00 : f32
    %228 = vector.shape_cast %227 : vector<32x1xi1> to vector<32x1xi1>
    %229 = vector.broadcast %228 : vector<32x1xi1> to vector<32x16xi1>
    %230 = vector.broadcast %cst_50 : f32 to vector<32x16xf32>
    %231 = arith.select %229, %2, %230 : vector<32x16xi1>, vector<32x16xf32>
    %c16_i32_51 = arith.constant 16 : i32
    %232 = vector.broadcast %c16_i32_51 : i32 to vector<32x1xi32>
    %233 = arith.cmpi sge, %213, %232 : vector<32x1xi32>
    %c24_i32 = arith.constant 24 : i32
    %234 = vector.broadcast %c24_i32 : i32 to vector<32x1xi32>
    %235 = arith.cmpi slt, %213, %234 : vector<32x1xi32>
    %236 = arith.andi %233, %235 : vector<32x1xi1>
    %cst_52 = arith.constant 0.000000e+00 : f32
    %237 = vector.shape_cast %236 : vector<32x1xi1> to vector<32x1xi1>
    %238 = vector.broadcast %237 : vector<32x1xi1> to vector<32x16xi1>
    %239 = vector.broadcast %cst_52 : f32 to vector<32x16xf32>
    %240 = arith.select %238, %2, %239 : vector<32x16xi1>, vector<32x16xf32>
    %c24_i32_53 = arith.constant 24 : i32
    %241 = vector.broadcast %c24_i32_53 : i32 to vector<32x1xi32>
    %242 = arith.cmpi sge, %213, %241 : vector<32x1xi32>
    %c32_i32 = arith.constant 32 : i32
    %243 = vector.broadcast %c32_i32 : i32 to vector<32x1xi32>
    %244 = arith.cmpi slt, %213, %243 : vector<32x1xi32>
    %245 = arith.andi %242, %244 : vector<32x1xi1>
    %cst_54 = arith.constant 0.000000e+00 : f32
    %246 = vector.shape_cast %245 : vector<32x1xi1> to vector<32x1xi1>
    %247 = vector.broadcast %246 : vector<32x1xi1> to vector<32x16xi1>
    %248 = vector.broadcast %cst_54 : f32 to vector<32x16xf32>
    %249 = arith.select %247, %2, %248 : vector<32x16xi1>, vector<32x16xf32>
    %250 = tpu.concatenate %222, %231, %240, %249 in 1 : vector<32x16xf32>, vector<32x16xf32>, vector<32x16xf32>, vector<32x16xf32> -> vector<32x64xf32>
    %251 = arith.truncf %250 : vector<32x64xf32> to vector<32x64xbf16>
    %252 = arith.truncf %212 : vector<64x16xf32> to vector<64x16xbf16>
    %cst_55 = arith.constant dense<0.000000e+00> : vector<32x16xf32>
    %253 = tpu.matmul %251, %252, %cst_55 {dimension_numbers = #tpu.dot_dimension_numbers<[1], [0], [0], [1], [0, 0, 1, 1], [], []>} : vector<32x64xbf16>, vector<64x16xbf16>, vector<32x16xf32> -> vector<32x16xf32>
    %c0_56 = arith.constant 0 : index
    %c0_57 = arith.constant 0 : index
    %254 = vector.load %arg8[%c0_56, %c0_57] : memref<64x32xbf16, #tpu.memory_space<vmem>>, vector<64x32xbf16>
    %255 = arith.truncf %253 : vector<32x16xf32> to vector<32x16xbf16>
    %cst_58 = arith.constant dense<0.000000e+00> : vector<64x16xf32>
    %256 = tpu.matmul %254, %255, %cst_58 {dimension_numbers = #tpu.dot_dimension_numbers<[1], [0], [0], [1], [0, 0, 1, 1], [], []>} : vector<64x32xbf16>, vector<32x16xbf16>, vector<64x16xf32> -> vector<64x16xf32>
    %c0_59 = arith.constant 0 : index
    %c0_60 = arith.constant 0 : index
    %257 = vector.load %arg9[%c0_59, %c0_60] : memref<64x1xf32, #tpu.memory_space<vmem>>, vector<64x1xf32>
    %258 = vector.broadcast %257 : vector<64x1xf32> to vector<64x16xf32>
    %259 = arith.addf %256, %258 : vector<64x16xf32>
    %260 = vector.extract_strided_slice %259 {offsets = [0, 0], sizes = [32, 16], strides = [1, 1]} : vector<64x16xf32> to vector<32x16xf32>
    %261 = vector.extract_strided_slice %259 {offsets = [32, 0], sizes = [32, 16], strides = [1, 1]} : vector<64x16xf32> to vector<32x16xf32>
    %c0_61 = arith.constant 0 : index
    %c0_62 = arith.constant 0 : index
    %262 = vector.load %arg10[%c0_61, %c0_62] : memref<32x16xf32, #tpu.memory_space<vmem>>, vector<32x16xf32>
    %263 = arith.addf %261, %262 : vector<32x16xf32>
    %264 = arith.truncf %15 : vector<32x16xf32> to vector<32x16xbf16>
    %265 = arith.truncf %260 : vector<32x16xf32> to vector<32x16xbf16>
    %cst_63 = arith.constant dense<0.000000e+00> : vector<32x32xf32>
    %266 = tpu.matmul %264, %265, %cst_63 {dimension_numbers = #tpu.dot_dimension_numbers<[1], [1], [0], [0], [0, 0, 1, 0], [], []>} : vector<32x16xbf16>, vector<32x16xbf16>, vector<32x32xf32> -> vector<32x32xf32>
    %cst_64 = arith.constant 0.176776692 : f32
    %267 = vector.broadcast %cst_64 : f32 to vector<32x32xf32>
    %268 = arith.mulf %266, %267 : vector<32x32xf32>
    %c0_65 = arith.constant 0 : index
    %c0_66 = arith.constant 0 : index
    %269 = vector.load %arg11[%c0_65, %c0_66] : memref<32x32xf32, #tpu.memory_space<vmem>>, vector<32x32xf32>
    %270 = arith.addf %268, %269 : vector<32x32xf32>
    %cst_67 = arith.constant dense<0xFF800000> : vector<32xf32>
    %271 = vector.multi_reduction <maximumf>, %270, %cst_67 [1] : vector<32x32xf32> to vector<32xf32>
    %272 = vector.shape_cast %271 : vector<32xf32> to vector<32x1xf32>
    %273 = vector.broadcast %272 : vector<32x1xf32> to vector<32x32xf32>
    %274 = arith.subf %270, %273 : vector<32x32xf32>
    %275 = math.exp %274 : vector<32x32xf32>
    %cst_68 = arith.constant dense<0.000000e+00> : vector<32xf32>
    %276 = vector.multi_reduction <add>, %275, %cst_68 [1] : vector<32x32xf32> to vector<32xf32>
    %277 = vector.shape_cast %276 : vector<32xf32> to vector<32x1xf32>
    %278 = tpu.reciprocal %277 {approx = true} : vector<32x1xf32> -> vector<32x1xf32>
    %279 = vector.broadcast %278 : vector<32x1xf32> to vector<32x32xf32>
    %280 = arith.mulf %275, %279 : vector<32x32xf32>
    %281 = arith.truncf %280 : vector<32x32xf32> to vector<32x32xbf16>
    %282 = arith.truncf %263 : vector<32x16xf32> to vector<32x16xbf16>
    %cst_69 = arith.constant dense<0.000000e+00> : vector<32x16xf32>
    %283 = tpu.matmul %281, %282, %cst_69 {dimension_numbers = #tpu.dot_dimension_numbers<[1], [0], [0], [1], [0, 0, 1, 1], [], []>} : vector<32x32xbf16>, vector<32x16xbf16>, vector<32x16xf32> -> vector<32x16xf32>
    %c0_70 = arith.constant 0 : index
    %c0_71 = arith.constant 0 : index
    %284 = vector.load %arg12[%c0_70, %c0_71] : memref<32x32xbf16, #tpu.memory_space<vmem>>, vector<32x32xbf16>
    %285 = arith.truncf %283 : vector<32x16xf32> to vector<32x16xbf16>
    %cst_72 = arith.constant dense<0.000000e+00> : vector<32x16xf32>
    %286 = tpu.matmul %284, %285, %cst_72 {dimension_numbers = #tpu.dot_dimension_numbers<[1], [0], [0], [1], [0, 0, 1, 1], [], []>} : vector<32x32xbf16>, vector<32x16xbf16>, vector<32x16xf32> -> vector<32x16xf32>
    %c0_73 = arith.constant 0 : index
    %c0_74 = arith.constant 0 : index
    %287 = vector.load %arg13[%c0_73, %c0_74] : memref<32x1xf32, #tpu.memory_space<vmem>>, vector<32x1xf32>
    %288 = vector.broadcast %287 : vector<32x1xf32> to vector<32x16xf32>
    %289 = arith.addf %286, %288 : vector<32x16xf32>
    %c0_75 = arith.constant 0 : index
    %c0_76 = arith.constant 0 : index
    %c0_77 = arith.constant 0 : index
    %290 = vector.load %arg14[%c0_75, %c0_76, %c0_77] : memref<1x32x16xf32, #tpu.memory_space<vmem>>, vector<1x32x16xf32>
    %291 = vector.shape_cast %290 : vector<1x32x16xf32> to vector<32x16xf32>
    %292 = vector.shape_cast %289 : vector<32x16xf32> to vector<1x32x16xf32>
    tpu.vector_store %arg14[%c0_75, %c0_76, %c0_77], %292 {strides = array<i32>} : memref<1x32x16xf32, #tpu.memory_space<vmem>>, vector<1x32x16xf32>,
    return
  }
  func.func @transform_0(%arg0: i32) -> (i32, i32, i32) {
    %c0_i32 = arith.constant 0 : i32
    %c0_i32_0 = arith.constant 0 : i32
    %c0_i32_1 = arith.constant 0 : i32
    return %arg0, %c0_i32, %c0_i32_0 : i32, i32, i32
  }
  func.func @transform_1(%arg0: i32) -> (i32, i32) {
    %c0_i32 = arith.constant 0 : i32
    %c0_i32_0 = arith.constant 0 : i32
    %c0_i32_1 = arith.constant 0 : i32
    return %c0_i32, %c0_i32_0 : i32, i32
  }
  func.func @transform_2(%arg0: i32) -> (i32, i32) {
    %c0_i32 = arith.constant 0 : i32
    %c0_i32_0 = arith.constant 0 : i32
    %c0_i32_1 = arith.constant 0 : i32
    return %c0_i32, %c0_i32_0 : i32, i32
  }
  func.func @transform_3(%arg0: i32) -> (i32, i32) {
    %c0_i32 = arith.constant 0 : i32
    %c0_i32_0 = arith.constant 0 : i32
    %c0_i32_1 = arith.constant 0 : i32
    return %c0_i32, %c0_i32_0 : i32, i32
  }
  func.func @transform_4(%arg0: i32) -> (i32, i32) {
    %c0_i32 = arith.constant 0 : i32
    %c0_i32_0 = arith.constant 0 : i32
    %c0_i32_1 = arith.constant 0 : i32
    return %c0_i32, %c0_i32_0 : i32, i32
  }
  func.func @transform_5(%arg0: i32) -> (i32, i32) {
    %c0_i32 = arith.constant 0 : i32
    %c0_i32_0 = arith.constant 0 : i32
    %c0_i32_1 = arith.constant 0 : i32
    return %c0_i32, %c0_i32_0 : i32, i32
  }
  func.func @transform_6(%arg0: i32) -> (i32, i32) {
    %c0_i32 = arith.constant 0 : i32
    %c0_i32_0 = arith.constant 0 : i32
    %c0_i32_1 = arith.constant 0 : i32
    return %c0_i32, %c0_i32_0 : i32, i32
  }
  func.func @transform_7(%arg0: i32) -> (i32, i32) {
    %c0_i32 = arith.constant 0 : i32
    %c0_i32_0 = arith.constant 0 : i32
    %c0_i32_1 = arith.constant 0 : i32
    return %c0_i32, %c0_i32_0 : i32, i32
  }
  func.func @transform_8(%arg0: i32) -> (i32, i32) {
    %c0_i32 = arith.constant 0 : i32
    %c0_i32_0 = arith.constant 0 : i32
    %c0_i32_1 = arith.constant 0 : i32
    return %c0_i32, %c0_i32_0 : i32, i32
  }
  func.func @transform_9(%arg0: i32) -> (i32, i32) {
    %c0_i32 = arith.constant 0 : i32
    %c0_i32_0 = arith.constant 0 : i32
    %c0_i32_1 = arith.constant 0 : i32
    return %c0_i32, %c0_i32_0 : i32, i32
  }
  func.func @transform_10(%arg0: i32) -> (i32, i32) {
    %c0_i32 = arith.constant 0 : i32
    %c0_i32_0 = arith.constant 0 : i32
    %c0_i32_1 = arith.constant 0 : i32
    return %c0_i32, %c0_i32_0 : i32, i32
  }
  func.func @transform_11(%arg0: i32) -> (i32, i32) {
    %c0_i32 = arith.constant 0 : i32
    %c0_i32_0 = arith.constant 0 : i32
    %c0_i32_1 = arith.constant 0 : i32
    return %c0_i32, %c0_i32_0 : i32, i32
  }
  func.func @transform_12(%arg0: i32) -> (i32, i32) {
    %c0_i32 = arith.constant 0 : i32
    %c0_i32_0 = arith.constant 0 : i32
    %c0_i32_1 = arith.constant 0 : i32
    return %c0_i32, %c0_i32_0 : i32, i32
  }
  func.func @transform_13(%arg0: i32) -> (i32, i32, i32) {
    %c0_i32 = arith.constant 0 : i32
    %c0_i32_0 = arith.constant 0 : i32
    %c0_i32_1 = arith.constant 0 : i32
    return %arg0, %c0_i32, %c0_i32_0 : i32, i32, i32
  }
}

</mosaic_0001>

<bundles_post_ra>
// kernel: tpu_custom_call.1
= control target key start
LH: loop header
LB: loop body
LE: loop exit
PB: predicated region body
PF: predicated region fallthrough
CT: control target
= control target key end

     0   :  { %s2060_s27 = smov 0   ;;  %s2397_s0 = inlined_call_operand.vmem [shape: f32[2,32,20], index: 0, kind: input, shape index: {}]   ;;  %s2398_s1 = inlined_call_operand.vmem [shape: f32[32,32], index: 1, kind: input, shape index: {}]   ;;  %s2399_s2 = inlined_call_operand.vmem [shape: f32[32,1], index: 2, kind: input, shape index: {}]   ;;  %s2400_s3 = inlined_call_operand.vmem [shape: f32[8,40], index: 3, kind: input, shape index: {}]   ;;  %s2401_s4 = inlined_call_operand.vmem [shape: f32[8,1], index: 4, kind: input, shape index: {}]   ;;  %s2402_s5 = inlined_call_operand.vmem [shape: f32[1,8], index: 5, kind: input, shape index: {}]   ;;  %s2403_s6 = inlined_call_operand.<no memory space> [shape: f32[1,1], index: 6, kind: input, shape index: {}]   ;;  %s2404_s7 = inlined_call_operand.vmem [shape: bf16[64,32], index: 7, kind: input, shape index: {}]   ;;  %s2405_s8 = inlined_call_operand.vmem [shape: f32[64,1], index: 8, kind: input, shape index: {}]   ;;  %s2406_s9 = inlined_call_operand.vmem [shape: f32[32,16], index: 9, kind: input, shape index: {}]   ;;  %s2407_s10 = inlined_call_operand.vmem [shape: f32[32,32], index: 10, kind: input, shape index: {}]   ;;  %s2408_s11 = inlined_call_operand.vmem [shape: bf16[32,32], index: 11, kind: input, shape index: {}]   ;;  %s2409_s12 = inlined_call_operand.vmem [shape: f32[32,1], index: 12, kind: input, shape index: {}]   ;;  %s2410_s13 = inlined_call_operand.vmem [shape: f32[2,32,16], index: 13, kind: output, shape index: {}]  }
   0x1   :  { %v18_v0 = vstv %s2403_s6 }
   0x2   :  { %19 = vst [vmem:[#allocation2] sm:$0x1] %v18_v0 }
   0x3 LB: > { %s1677_s28 = sadd.s32 4294967295, %s1960_s27   ;;  %p1681_p0 = scmp.ge.s32.totalorder %s1960_s27, 1  ;;  %s1960_s27 = sphi %s2060_s27, %s25_s27  }
   0x4   : > { %p389_p1 = scmp.lt.s32.totalorder %s1960_s27, 3 }
   0x6   : > { %p390_p2 = pnand %p1681_p0, %p389_p1 }
   0x7   : > { %p433_p3 = scmp.lt.s32.totalorder (!%p390_p2), %s1677_s28, 1  ;;  %s1963_s15 = smov (!%p390_p2), 13  }
   0x8   : > { %393 = sbr.rel (%p390_p2) target bundleno = 2315 (0x90b), region = 72  ;;  %s1964_s16 = smov (!%p390_p2), 12  }
   0x9   : > { %s1965_s17 = smov (!%p390_p2), 14   ;;  %s1966_s18 = smov (!%p390_p2), 16  }
   0xa   : > { %s1967_s20 = smov (!%p390_p2), 15   ;;  %s1968_s21 = smov (!%p390_p2), 125  }
   0xb   : > { %s1970_s22 = smov (!%p390_p2), 126   ;;  %s1971_s23 = smov (!%p390_p2), 124  }
   0xc   : > { %s1973_s25 = smov (!%p390_p2), 47   ;;  %s1974_s26 = smov (!%p390_p2), 44  }
   0xd   : > { %v450_v1 = vld [vmem:[%s2398_s1] sm:$0xff]  ;;  %vm478_vm0 = vcmask 261120   ;;  %v1962_v2 = vmov 0   ;;  %s2423_s28 = smov (!%p433_p3, %s1677_s28), 1  ;;  %v456_v4 = vld [vmem:[%s2399_s2 + $0x10] sm:$0xff]  ;;  %v455_v5 = vld [vmem:[%s2399_s2 + $0x8] sm:$0xff]  ;;  %v448_v14 = vlaneseq }
   0xe   : > { %1764 = vmatprep.mubr.msk.f32.mxu0 %vm478_vm0, %v450_v1  ;;  %1873 = vset.pattern.permute.xlu0 %v1962_v2  ;;  %v454_v3 = vld [vmem:[%s2399_s2] sm:$0xff]  ;;  %s1714_s19 = sshll.u32 %s2423_s28, 5  ;;  %v457_v6 = vld [vmem:[%s2399_s2 + $0x18] sm:$0xff]  ;;  %v451_v11 = vld [vmem:[%s2398_s1 + $0x8] sm:$0xff]  ;;  %v1969_v33 = vmov 0.0   ;;  %s1975_s29 = smov 28  }
   0xf   : > { %460 = vperm.xlu0 %1873, %v454_v3   ;;  %1874 = vset.pattern.permute.xlu1 %v1962_v2  ;;  %s437_s24 = scalar_lea.vmem %s2397_s0, %s1714_s19  ;;  %v452_v12 = vld [vmem:[%s2398_s1 + $0x10] sm:$0xff]  ;;  %v453_v13 = vld [vmem:[%s2398_s1 + $0x18] sm:$0xff]  ;;  %v2123_v16 = vand.u32 127, %v448_v14  ;;  %s1976_s30 = smov 45   ;;  %vm1978_vm2 = vmmov 0   ;;  %v662_v34 = vld [vmem:[%s2401_s4] sm:$0xff] }
  0x10   : > { %470 = vperm.xlu1 %1874, %v456_v4   ;;  %v2094_v7 = vld [vmem:[%s437_s24 + $0x18] sm:$0xff]  ;;  %v2096_v8 = vld [vmem:[%s437_s24 + $0x10] sm:$0xff]  ;;  %v2100_v9 = vld [vmem:[%s437_s24 + $0x8] sm:$0xff]  ;;  %1770 = vmatprep.subr.mxu1 %v1969_v33  ;;  %s1977_s6 = smov 29   ;;  %s1979_s14 = smov 46   ;;  %vm595_vm3 = vcmask 130048  }
  0x11   : > { %1756 = vmatprep.subr.mxu0 %v2094_v7  ;;  %v2104_v10 = vld [vmem:[%s437_s24] sm:$0xff]  ;;  %vm576_vm1 = vcmp.ge.s32.totalorder %v2123_v16, 4  ;;  %s1972_s24 = smov 127   ;;  %1780 = vmatprep.mubr.msk.f32.mxu1 %vm1978_vm2, %v1969_v33  ;;  %vm2411_vm4 = vcmask 392192   ;;  %vm668_vm5 = vcmask 326656   ;;  %vm753_vm6 = vcmask 64512  }
  0x12   : > { %1757 = vmatpush3.msra.mxu0 %v2094_v7  ;;  %v742_v35 = vld [vmem:[#allocation2] sm:$0x1] }
  0x13   : > { %465 = vperm.xlu0 %1873, %v455_v5   ;;  %1758 = vmatprep.subr.mxu0 %v2096_v8 }
  0x14   : > { %475 = vperm.xlu1 %1874, %v457_v6   ;;  %1759 = vmatpush3.msra.mxu0 %v2096_v8  ;;  %v661_v6 = vld [vmem:[%s2400_s3] sm:$0xff] }
  0x15   : > { %1760 = vmatprep.subr.mxu0 %v2100_v9 }
  0x16   : > { %1761 = vmatpush3.msra.mxu0 %v2100_v9 }
  0x17   : > { %1762 = vmatprep.subr.mxu0 %v2104_v10 }
  0x18   : > { %1763 = vmatpush3.msra.mxu0 %v2104_v10 }
  0x19   : > { %1765 = vmatmul.mubr.msk.f32.vlgmr.msra.gmra.mxu0 %vm478_vm0, %v451_v11 }
  0x1a   : > { %1767 = vmatprep.mubr.msk.f32.mxu0 %vm478_vm0, %v452_v12 }
  0x1d   : > { %1768 = vmatmul.mubr.msk.f32.gmra.mxu0 %vm478_vm0, %v453_v13 }
  0x8a   : > { %v461_v15 = vpop.permute.xlu0 %460 }
  0x8b   : > { %v471_v17 = vpop.permute.xlu1 %470 }
  0x8e   : > { %v466_v18 = vpop.permute.xlu0 %465 }
  0x8f   : > { %v476_v22 = vpop.permute.xlu1 %475 }
  0xd9   : > { %v1766_v19 = vpop.f32.mrf.mxu0 }
  0xda   : > { %v563_v20 = vadd.f32 %v1766_v19, %v466_v18  ;;  %v1875_v19 = vpack.i.bf16 %v1969_v33, %v2104_v10 }
  0xdb   : > { %v557_v21 = vpop.f32.mrf.mxu0 }
  0xdc   : > { %v2128_v23 = vsel %vm576_vm1, %v563_v20, 0.0  ;;  %v558_v27 = vadd.f32 %v557_v21, %v461_v15  ;;  %v1880_v20 = vpack.i.bf16 %v2100_v9, %v1969_v33 }
  0xdd   : > { %634 = vrot.lane.b32.xlu0 %v2128_v23, %s1963_s15  ;;  %649 = vrot.lane.b32.xlu1 %v2128_v23, %s1964_s16  ;;  %v1769_v24 = vpop.f32.mrf.mxu0  ;;  %s1980_s15 = smov 30  }
  0xde   : > { %v573_v25 = vadd.f32 %v1769_v24, %v476_v22  ;;  %v2148_v32 = vsel %vm576_vm1, %v558_v27, 0.0  ;;  %v750_v24 = vshrl.u32 %v448_v14, 7 }
  0xdf   : > { %v567_v26 = vpop.f32.mrf.mxu0 }
  0xe0   : > { %v2135_v28 = vsel %vm576_vm1, %v573_v25, 0.0  ;;  %v568_v29 = vadd.f32 %v567_v26, %v471_v17  ;;  %v743_v17 = vld [vmem:[%s2402_s5] sm:$0x1]  ;;  %v751_v27 = vsub.s32 0, %v750_v24 }
  0xe1   : > { %619 = vrot.lane.b32.xlu0 %v2128_v23, %s1965_s17  ;;  %584 = vrot.lane.b32.xlu1 %v2128_v23, %s1966_s18  ;;  %s1981_s17 = smov 32  }
  0xe2   : > { %v2142_v30 = vsel %vm576_vm1, %v568_v29, 0.0 }
  0xe3   : > { %v1338_v31 = vpack.c.bf16 %v2135_v28, %v2142_v30 }
  0xe5   : > { %604 = vrot.lane.b32.xlu0 %v2128_v23, %s1967_s20  ;;  %631 = vrot.lane.b32.xlu1 %v2148_v32, %s1968_s21  ;;  %s1982_s20 = smov 31  }
  0xe9   : > { %616 = vrot.lane.b32.xlu1 %v2148_v32, %s1970_s22  ;;  %646 = vrot.lane.b32.xlu0 %v2148_v32, %s1971_s23 }
  0xed   : > { %601 = vrot.lane.b32.xlu1 %v2148_v32, %s1972_s24  ;;  %610 = vrot.lane.b32.xlu0 %v2135_v28, %s1973_s25  ;;  %s1983_s24 = smov 48  }
  0xf1   : > { %655 = vrot.lane.b32.xlu1 %v2135_v28, %s1974_s26  ;;  %652 = vrot.lane.b32.xlu0 %v2142_v30, %s1975_s29 }
  0xf5   : > { %640 = vrot.lane.b32.xlu1 %v2135_v28, %s1976_s30  ;;  %637 = vrot.lane.b32.xlu0 %v2142_v30, %s1977_s6 }
  0xf9   : > { %625 = vrot.lane.b32.xlu1 %v2135_v28, %s1979_s14  ;;  %622 = vrot.lane.b32.xlu0 %v2142_v30, %s1980_s15  ;;  %s1984_s14 = smov 96   ;;  %s1985_s15 = smov 80  }
  0xfd   : > { %588 = vrot.lane.b32.xlu1 %v2142_v30, %s1981_s17  ;;  %607 = vrot.lane.b32.xlu0 %v2142_v30, %s1982_s20 }
 0x101   : > { %665 = vperm.xlu1 %1874, %v662_v34   ;;  %592 = vrot.lane.b32.xlu0 %v2135_v28, %s1983_s24 }
 0x105   : > { %746 = vperm.xlu0 %1873, %v742_v35   ;;  %827 = vrot.lane.b32.xlu1 %v2123_v16, %s1966_s18 }
 0x109   : > { %829 = vrot.lane.b32.xlu0 %v2123_v16, %s1981_s17  ;;  %831 = vrot.lane.b32.xlu1 %v2123_v16, %s1983_s24  ;;  %s1986_s17 = smov 112  }
 0x10d   : > { %1876 = vrot.lane.b32.xlu1 %v1875_v19, %s1971_s23  ;;  %1881 = vrot.lane.b32.xlu0 %v1880_v20, %s1964_s16  ;;  %v1925_v19 = vpack.i.bf16 %v2094_v7, %v1969_v33  ;;  %v1186_v20 = vld [vmem:[%s2405_s8 + $0x10] sm:$0xff]  ;;  %v1185_v7 = vld [vmem:[%s2405_s8 + $0x8] sm:$0xff] }
 0x14f   : > { %v635_v36 = vpop.permute.xlu0 %634  ;;  %v650_v37 = vpop.permute.xlu1 %649 }
 0x153   : > { %v620_v38 = vpop.permute.xlu0 %619  ;;  %v585_v39 = vpop.permute.xlu1 %584 }
 0x154   : > { %v596_v3 = vsel %vm595_vm3, %v2148_v32, %v585_v39 }
 0x157   : > { %v605_v40 = vpop.permute.xlu0 %604  ;;  %v632_v41 = vpop.permute.xlu1 %631 }
 0x158   : > { %v643_v51 = vsel %vm595_vm3, %v632_v41, %v635_v36 }
 0x15b   : > { %v617_v42 = vpop.permute.xlu1 %616  ;;  %v647_v43 = vpop.permute.xlu0 %646 }
 0x15c   : > { %v658_v46 = vsel %vm595_vm3, %v647_v43, %v650_v37  ;;  %v628_v56 = vsel %vm595_vm3, %v617_v42, %v620_v38 }
 0x15f   : > { %v602_v44 = vpop.permute.xlu1 %601  ;;  %v611_v45 = vpop.permute.xlu0 %610 }
 0x160   : > { %v613_v61 = vsel %vm595_vm3, %v602_v44, %v605_v40 }
 0x163   : > { %v656_v47 = vpop.permute.xlu1 %655  ;;  %v653_v48 = vpop.permute.xlu0 %652 }
 0x164   : > { %v659_v49 = vsel %vm478_vm0, %v658_v46, %v653_v48 }
 0x165   : > { %v660_v50 = vsel %vm2411_vm4, %v659_v49, %v656_v47 }
 0x166   : > { %1771 = vmatpush3.msra.mxu1 %v660_v50 }
 0x167   : > { %v641_v52 = vpop.permute.xlu1 %640  ;;  %v638_v53 = vpop.permute.xlu0 %637  ;;  %1772 = vmatprep.subr.mxu1 %v1969_v33 }
 0x168   : > { %v644_v54 = vsel %vm478_vm0, %v643_v51, %v638_v53 }
 0x169   : > { %v645_v55 = vsel %vm2411_vm4, %v644_v54, %v641_v52 }
 0x16a   : > { %1773 = vmatpush3.msra.mxu1 %v645_v55  ;;  %v856_v55 = vadd.s32 8, %v750_v24 }
 0x16b   : > { %v626_v57 = vpop.permute.xlu1 %625  ;;  %v623_v58 = vpop.permute.xlu0 %622  ;;  %1774 = vmatprep.subr.mxu1 %v1969_v33 }
 0x16c   : > { %v629_v59 = vsel %vm478_vm0, %v628_v56, %v623_v58 }
 0x16d   : > { %v630_v60 = vsel %vm2411_vm4, %v629_v59, %v626_v57 }
 0x16e   : > { %1775 = vmatpush3.msra.mxu1 %v630_v60 }
 0x16f   : > { %v608_v62 = vpop.permute.xlu0 %607  ;;  %1776 = vmatprep.subr.mxu1 %v1969_v33  ;;  %v589_v63 = vpop.permute.xlu1 %588 }
 0x170   : > { %v614_v0 = vsel %vm478_vm0, %v613_v61, %v608_v62  ;;  %v597_v4 = vsel %vm478_vm0, %v596_v3, %v589_v63 }
 0x171   : > { %v615_v1 = vsel %vm2411_vm4, %v614_v0, %v611_v45 }
 0x172   : > { %1777 = vmatpush3.msra.mxu1 %v615_v1 }
 0x173   : > { %v593_v5 = vpop.permute.xlu0 %592  ;;  %1778 = vmatprep.subr.mxu1 %v1969_v33 }
 0x174   : > { %v599_v11 = vsel %vm2411_vm4, %v597_v4, %v593_v5 }
 0x175   : > { %1779 = vmatpush3.msra.mxu1 %v599_v11 }
 0x176   : > { %1781 = vmatmul.mubr.msk.f32.vlgmr.msra.gmra.mxu1 %vm668_vm5, %v661_v6  ;;  %1783 = vmatprep.subr.mxu1 %v1969_v33 }
 0x177   : > { %1785 = vmatprep.mubr.msk.f32.mxu1 %vm1978_vm2, %v1969_v33 }
 0x17c   : > { %v666_v12 = vpop.permute.xlu1 %665 }
 0x180   : > { %v747_v21 = vpop.permute.xlu0 %746  ;;  %v828_v22 = vpop.permute.xlu1 %827 }
 0x181   : > { %v833_v25 = vsel %vm595_vm3, %v2123_v16, %v828_v22  ;;  %v752_v10 = vrot.slane %v747_v21, %v751_v27  ;;  %v1184_v21 = vld [vmem:[%s2405_s8] sm:$0xff] }
 0x184   : > { %v830_v26 = vpop.permute.xlu0 %829  ;;  %v832_v34 = vpop.permute.xlu1 %831 }
 0x185   : > { %v834_v29 = vsel %vm478_vm0, %v833_v25, %v830_v26 }
 0x186   : > { %v835_v35 = vsel %vm2411_vm4, %v834_v29, %v832_v34 }
 0x187   : > { %vm836_vm7 = vcmp.lt.s32.totalorder %v835_v35, 2  ;;  %v840_v40 = vcvt.s32.f32 %v835_v35 }
 0x188   : > { %v1877_v22 = vpop.permute.xlu1 %1876 }
 0x236   : > { %v738_v13 = vpop.f32.mrf.mxu1 }
 0x237   : > { %v739_v15 = vadd.f32 %v738_v13, %v666_v12 }
 0x238   : > { %v1782_v18 = vpop.f32.mrf.mxu1 }
 0x239   : > { %1784 = vmatpush3.msra.mxu1 %v739_v15  ;;  %v1915_v18 = vpack.i.bf16 %v1969_v33, %v2096_v8  ;;  %v1187_v8 = vld [vmem:[%s2405_s8 + $0x18] sm:$0xff] }
 0x23a   : > { %1786 = vmatmul.mubr.msk.f32.vlgmr.msra.gmra.mxu1 %vm753_vm6, %v743_v17 }
 0x2fa   : > { %v823_v9 = vpop.f32.mrf.mxu1 }
 0x2fb   : > { %v824_v36 = vadd.f32 %v823_v9, %v752_v10 }
 0x2fc   : > { %v1787_v37 = vpop.f32.mrf.mxu1 }
 0x2fd   : > { %v837_v38 = vsel %vm836_vm7, %v752_v10, %v824_v36  ;;  %v1878_v37 = vunpack.i.l.bf16 %v1877_v22 }
 0x2fe   : > { %1936 = vtanh.f32 %v837_v38 }
 0x30b   : > { %v1937_v39 = vpop.eup %1936 }
 0x30c   : > { %v839_v14 = vmul.f32 5.0, %v1937_v39 }
 0x30e   : > { %v841_v41 = vadd.f32 %v840_v40, %v839_v14 }
 0x310   : > { %v842_v42 = vmul.f32 2.0, %v841_v41 }
 0x312   : > { %v844_v16 = vmul.f32 0.05263158, %v842_v42 }
 0x314   : > { %v1692_v43 = vadd.f32 -1.0, %v844_v16 }
 0x316   : > { %v846_v44 = vadd.f32 1.0, %v1692_v43 }
 0x318   : > { %v847_v45 = vmul.f32 16.0, %v846_v44 }
 0x31a   : > { %v1693_v46 = vadd.f32 -1.0, %v847_v45 }
 0x31c   : > { %v849_v47 = vmul.f32 0.5, %v1693_v46 }
 0x31e   : > { %v850_v48 = vfloor.f32 %v849_v47 }
 0x320   : > { %v1838_v49 = vtrunc.f32 %v850_v48  ;;  %v851_v58 = vsub.f32 %v849_v47, %v850_v48 }
 0x322   : > { %v1839_v50 = vcvt.f32.s32 %v1838_v49  ;;  %v881_v4 = vsub.f32 1.0, %v851_v58 }
 0x324   : > { %v853_v51 = vadd.s32 1, %v1839_v50  ;;  %v860_v52 = vrot.slane %v1839_v50, %v751_v27  ;;  %vm863_vm8 = vcmp.ge.s32.totalorder %v1839_v50, 0  ;;  %vm872_vm9 = vcmp.le.s32.totalorder %v1839_v50, 15 }
 0x325   : > { %v864_v53 = vsel %vm863_vm8, 1, %v1962_v2  ;;  %v873_v54 = vsel %vm872_vm9, 1, %v1962_v2  ;;  %v915_v5 = vrot.slane %v881_v4, %v751_v27 }
 0x326   : > { %v868_v56 = vrot.slane %v864_v53, %v751_v27  ;;  %v877_v57 = vrot.slane %v873_v54, %v751_v27  ;;  %vm861_vm10 = vcmp.eq.s32.totalorder %v750_v24, %v860_v52  ;;  %vm888_vm11 = vcmp.ge.s32.totalorder %v853_v51, 0 }
 0x327   : > { %vm897_vm12 = vcmp.le.s32.totalorder %v853_v51, 15  ;;  %v885_v59 = vrot.slane %v853_v51, %v751_v27  ;;  %v889_v60 = vsel %vm888_vm11, 1, %v1962_v2  ;;  %vm862_vm1 = vcmp.eq.s32.totalorder %v856_v55, %v860_v52 }
 0x328   : > { %vm869_vm13 = vcmp.eq.s32.totalorder %v868_v56, 1  ;;  %v898_v61 = vsel %vm897_vm12, 1, %v1962_v2  ;;  %vm2226_vm15 = vcmp.eq.s32.totalorder %v877_v57, 1  ;;  %v893_v0 = vrot.slane %v889_v60, %v751_v27 }
 0x329   : > { %vm2222_vm14 = vmand %vm861_vm10, %vm869_vm13  ;;  %v902_v1 = vrot.slane %v898_v61, %v751_v27  ;;  %vm886_vm7 = vcmp.eq.s32.totalorder %v750_v24, %v885_v59  ;;  %vm887_vm9 = vcmp.eq.s32.totalorder %v856_v55, %v885_v59  ;;  %v909_v2 = vrot.slane %v851_v58, %v751_v27  ;;  %v1882_v24 = vpop.permute.xlu0 %1881 }
 0x32a   : > { %vm2230_vm2 = vmand %vm862_vm1, %vm869_vm13  ;;  %vm894_vm5 = vcmp.eq.s32.totalorder %v893_v0, 1  ;;  %v1884_v38 = vunpack.i.h.bf16 %v1882_v24  ;;  %v1883_v28 = vunpack.i.l.bf16 %v1882_v24 }
 0x32b   : > { %vm879_vm6 = vmand %vm2222_vm14, %vm2226_vm15  ;;  %vm903_vm8 = vcmp.eq.s32.totalorder %v902_v1, 1 }
 0x32c   : > { %vm895_vm10 = vmand %vm886_vm7, %vm894_vm5  ;;  %v1100_v43 = vsel %vm595_vm3, %v1878_v37, %v1883_v28 }
 0x32d   : > { %vm896_vm11 = vmand %vm887_vm9, %vm894_vm5 }
 0x32e   : > { %vm904_vm12 = vmand %vm895_vm10, %vm903_vm8 }
 0x32f   : > { %vm905_vm4 = vmand %vm896_vm11, %vm903_vm8  ;;  %v910_v6 = vsel %vm904_vm12, %v909_v2, 0.0 }
 0x330   : > { %vm880_vm13 = vmand %vm2230_vm2, %vm2226_vm15  ;;  %v911_v11 = vsel %vm905_vm4, %v909_v2, 0.0  ;;  %v916_v12 = vsel %vm879_vm6, %v915_v5, %v910_v6  ;;  %vm2418_vm4 = vcmask 392192   ;;  %vm1118_vm15 = vcmask 523264  }
 0x331   : > { %v917_v13 = vsel %vm880_vm13, %v915_v5, %v911_v11  ;;  %vm2419_vm14 = vmmov %vm2418_vm4  ;;  %v1930_v5 = vld [vmem:[%s2404_s7] sm:$0xff]  }
 0x332   : > { %v1890_v15 = vpack.i.bf16 %v917_v13, %v916_v12  ;;  %v2242_v17 = vpack.c.bf16 %v917_v13, %v916_v12  ;;  %vm2420_vm1 = vmmov %vm2418_vm4  ;;  %1804 = vmatprep.mubr.msk.bf16.mxu1 %vm478_vm0, %v1930_v5 }
 0x333   : > { %vm2421_vm2 = vmmov %vm2420_vm1 }
 0x334   : > { %1891 = vrot.lane.b32.xlu1 %v1890_v15, %s1984_s14  ;;  %1886 = vrot.lane.b32.xlu0 %v1890_v15, %s1985_s15 }
 0x338   : > { %1896 = vrot.lane.b32.xlu1 %v1969_v33, %s1971_s23  ;;  %1901 = vrot.lane.b32.xlu0 %v1969_v33, %s1964_s16 }
 0x33c   : > { %1906 = vrot.lane.b32.xlu1 %v1969_v33, %s1975_s29  ;;  %1911 = vrot.lane.b32.xlu0 %v1890_v15, %s1986_s17 }
 0x340   : > { %1921 = vrot.lane.b32.xlu1 %v1969_v33, %s1974_s26  ;;  %1916 = vrot.lane.b32.xlu0 %v1915_v18, %s1975_s29  ;;  %v1337_v33 = vpack.c.bf16 %v2128_v23, %v2148_v32  ;;  %v1879_v32 = vunpack.i.h.bf16 %v1877_v22 }
 0x342   : > { %v1101_v16 = vsel %vm595_vm3, %v1879_v32, %v1884_v38 }
 0x344   : > { %1204 = vperm.xlu1 %1874, %v1186_v20   ;;  %1926 = vrot.lane.b32.xlu0 %v1925_v19, %s1974_s26  ;;  %v1931_v19 = vld [vmem:[%s2404_s7 + $0x8] sm:$0xff]   ;;  %v1932_v20 = vld [vmem:[%s2404_s7 + $0x10] sm:$0xff]   ;;  %s442_s26 = scalar_lea.vmem %s2410_s13, %s1714_s19 }
 0x348   : > { %1194 = vperm.xlu1 %1874, %v1184_v21   ;;  %1209 = vperm.xlu0 %1873, %v1187_v8   ;;  %v1933_v8 = vld [vmem:[%s2404_s7 + $0x18] sm:$0xff]  }
 0x34c   : > { %1343 = vrot.lane.b32.xlu1 %v1337_v33, %s1971_s23  ;;  %1199 = vperm.xlu0 %1873, %v1185_v7  }
 0x350   : > { %1345 = vrot.lane.b32.xlu0 %v1338_v31, %s1971_s23 }
 0x3a6   : > { %v1892_v25 = vpop.permute.xlu1 %1891  ;;  %v1887_v26 = vpop.permute.xlu0 %1886 }
 0x3a7   : > { %v1894_v27 = vunpack.i.h.bf16 %v1892_v25  ;;  %v1893_v29 = vunpack.i.l.bf16 %v1892_v25  ;;  %v1889_v34 = vunpack.i.h.bf16 %v1887_v26  ;;  %v1888_v10 = vunpack.i.l.bf16 %v1887_v26 }
 0x3a9   : > { %v1117_v35 = vpack.c.bf16 %v1889_v34, %v1888_v10  ;;  %v1116_v23 = vpack.c.bf16 %v1894_v27, %v1893_v29 }
 0x3aa   : > { %v1897_v9 = vpop.permute.xlu1 %1896  ;;  %v1902_v36 = vpop.permute.xlu0 %1901 }
 0x3ab   : > { %1788 = vmatprep.subr.bf16.mxu0 %v1117_v35  ;;  %v1899_v44 = vunpack.i.h.bf16 %v1897_v9  ;;  %v1898_v45 = vunpack.i.l.bf16 %v1897_v9  ;;  %v1904_v48 = vunpack.i.h.bf16 %v1902_v36  ;;  %v1903_v49 = vunpack.i.l.bf16 %v1902_v36 }
 0x3ac   : > { %1789 = vmatpush3.bf16.msra.mxu0 %v1117_v35 }
 0x3ad   : > { %1790 = vmatprep.subr.bf16.mxu0 %v1116_v23  ;;  %v1103_v60 = vsel %vm595_vm3, %v1899_v44, %v1904_v48  ;;  %v1102_v61 = vsel %vm595_vm3, %v1898_v45, %v1903_v49 }
 0x3ae   : > { %v1907_v30 = vpop.permute.xlu1 %1906  ;;  %v1912_v31 = vpop.permute.xlu0 %1911 }
 0x3af   : > { %v1914_v39 = vunpack.i.h.bf16 %v1912_v31  ;;  %v1913_v40 = vunpack.i.l.bf16 %v1912_v31  ;;  %v1909_v14 = vunpack.i.h.bf16 %v1907_v30  ;;  %v1908_v41 = vunpack.i.l.bf16 %v1907_v30 }
 0x3b0   : > { %1791 = vmatpush3.bf16.msra.mxu0 %v1116_v23 }
 0x3b1   : > { %v1115_v42 = vpack.c.bf16 %v1914_v39, %v1913_v40  ;;  %v1105_v52 = vsel %vm478_vm0, %v1101_v16, %v1909_v14  ;;  %v1104_v53 = vsel %vm478_vm0, %v1100_v43, %v1908_v41  ;;  %v1412_v14 = vld [vmem:[%s2407_s10] sm:$0xff]  ;;  %v1415_v16 = vld [vmem:[%s2407_s10 + $0x18] sm:$0xff] }
 0x3b2   : > { %v1922_v46 = vpop.permute.xlu1 %1921  ;;  %v1917_v47 = vpop.permute.xlu0 %1916 }
 0x3b3   : > { %v1924_v50 = vunpack.i.h.bf16 %v1922_v46  ;;  %v1923_v51 = vunpack.i.l.bf16 %v1922_v46  ;;  %1792 = vmatprep.subr.bf16.mxu0 %v1115_v42  ;;  %v1919_v54 = vunpack.i.h.bf16 %v1917_v47  ;;  %v1918_v55 = vunpack.i.l.bf16 %v1917_v47  ;;  %v1413_v46 = vld [vmem:[%s2407_s10 + $0x8] sm:$0xff] }
 0x3b4   : > { %1793 = vmatpush3.bf16.msra.mxu0 %v1115_v42 }
 0x3b5   : > { %v1108_v56 = vsel %vm2418_vm4, %v1104_v53, %v1923_v51  ;;  %v1109_v57 = vsel %vm2419_vm14, %v1105_v52, %v1924_v50  ;;  %1794 = vmatprep.subr.bf16.mxu0 %v2242_v17  ;;  %v1106_v0 = vsel %vm478_vm0, %v1102_v61, %v1918_v55  ;;  %v1107_v1 = vsel %vm478_vm0, %v1103_v60, %v1919_v54  ;;  %v1414_v51 = vld [vmem:[%s2407_s10 + $0x10] sm:$0xff] }
 0x3b6   : > { %v1112_v58 = vpack.c.bf16 %v1109_v57, %v1108_v56  ;;  %v1927_v59 = vpop.permute.xlu0 %1926  ;;  %v1191_v57 = vld [vmem:[%s2405_s8 + $0x38] sm:$0xff] }
 0x3b7   : > { %v1929_v62 = vunpack.i.h.bf16 %v1927_v59  ;;  %v1928_v63 = vunpack.i.l.bf16 %v1927_v59 }
 0x3b8   : > { %1795 = vmatpush3.bf16.msra.mxu0 %v2242_v17  ;;  %1796 = vmatprep.mubr.msk.bf16.mxu0 %vm1118_vm15, %v1112_v58  ;;  %v1190_v58 = vld [vmem:[%s2405_s8 + $0x30] sm:$0xff] }
 0x3b9   : > { %v1110_v3 = vsel %vm2420_vm1, %v1106_v0, %v1928_v63  ;;  %v1111_v4 = vsel %vm2421_vm2, %v1107_v1, %v1929_v62 }
 0x3ba   : > { %v1113_v2 = vpack.c.bf16 %v1111_v4, %v1110_v3 }
 0x3bc   : > { %1797 = vmatmul.mubr.msk.bf16.vlgmr.msra.gmra.mxu0 %vm1118_vm15, %v1113_v2 }
 0x3bf   : > { %v1205_v17 = vpop.permute.xlu1 %1204 }
 0x3c3   : > { %v1195_v21 = vpop.permute.xlu1 %1194  ;;  %v1210_v33 = vpop.permute.xlu0 %1209 }
 0x3c7   : > { %v1344_v7 = vpop.permute.xlu1 %1343  ;;  %v1200_v29 = vpop.permute.xlu0 %1199 }
 0x3cb   : > { %v1346_v37 = vpop.permute.xlu0 %1345 }
 0x47c   : > { %v1798_v6 = vpop.f32.mrf.mxu0 }
 0x47e   : > { %v1159_v11 = vpop.f32.mrf.mxu0 }
 0x480   : > { %v1799_v12 = vpop.f32.mrf.mxu0 }
 0x481   : > { %v1183_v13 = vpack.c.bf16 %v1799_v12, %v1798_v6 }
 0x482   : > { %v1162_v15 = vpop.f32.mrf.mxu0 }
 0x483   : > { %v1182_v18 = vpack.c.bf16 %v1162_v15, %v1159_v11  ;;  %1800 = vmatprep.subr.bf16.mxu1 %v1183_v13  ;;  %v1331_v15 = vld [vmem:[%s2406_s9 + $0x10] sm:$0xff] }
 0x484   : > { %1801 = vmatpush3.bf16.msra.mxu1 %v1183_v13  ;;  %v1332_v13 = vld [vmem:[%s2406_s9 + $0x18] sm:$0xff] }
 0x485   : > { %1802 = vmatprep.subr.bf16.mxu1 %v1182_v18 }
 0x488   : > { %1803 = vmatpush3.bf16.msra.mxu1 %v1182_v18 }
 0x48b   : > { %1805 = vmatmul.mubr.msk.bf16.vlgmr.msra.gmra.mxu1 %vm478_vm0, %v1931_v19 }
 0x48c   : > { %1808 = vmatprep.mubr.msk.bf16.mxu1 %vm478_vm0, %v1932_v20 }
 0x493   : > { %1809 = vmatmul.mubr.msk.bf16.gmra.mxu1 %vm478_vm0, %v1933_v8 }
 0x494   : > { %1816 = vmatprep.mubr.msk.bf16.mxu1 %vm595_vm3, %v1344_v7 }
 0x54b   : > { %v1806_v22 = vpop.f32.mrf.mxu1 }
 0x54c   : > { %v1307_v26 = vadd.f32 %v1806_v22, %v1205_v17 }
 0x54d   : > { %v1298_v24 = vpop.f32.mrf.mxu1 }
 0x54e   : > { %v1299_v10 = vadd.f32 %v1298_v24, %v1195_v21 }
 0x54f   : > { %v1807_v25 = vpop.f32.mrf.mxu1 }
 0x550   : > { %v1310_v27 = vadd.f32 %v1807_v25, %v1210_v33 }
 0x551   : > { %v1301_v34 = vpop.f32.mrf.mxu1 }
 0x552   : > { %v1340_v35 = vpack.c.bf16 %v1310_v27, %v1307_v26  ;;  %v1302_v9 = vadd.f32 %v1301_v34, %v1200_v29  ;;  %v1188_v29 = vld [vmem:[%s2405_s8 + $0x20] sm:$0xff] }
 0x553   : > { %v1810_v38 = vpop.f32.mrf.mxu1  ;;  %v1529_v34 = vld [vmem:[%s2409_s12] sm:$0xff] }
 0x554   : > { %v1339_v36 = vpack.c.bf16 %v1302_v9, %v1299_v10  ;;  %1836 = vmatprep.subr.msk.bf16.mxu1 %vm595_vm3, %v1340_v35  ;;  %v1357_v23 = vsel %vm595_vm3, %v1340_v35, 0  ;;  %v1531_v10 = vld [vmem:[%s2409_s12 + $0x10] sm:$0xff]  ;;  %v1189_v35 = vld [vmem:[%s2405_s8 + $0x28] sm:$0xff] }
 0x555   : > { %1813 = vmatpush3.bf16.xpose.msra.mxu1 %v1357_v23  ;;  %v2313_v28 = vpop.f32.mrf.mxu1  ;;  %v1530_v9 = vld [vmem:[%s2409_s12 + $0x8] sm:$0xff] }
 0x556   : > { %1837 = vmatprep.subr.msk.bf16.mxu1 %vm595_vm3, %v1339_v36  ;;  %v1354_v32 = vsel %vm595_vm3, %v1339_v36, 0  ;;  %v1532_v36 = vld [vmem:[%s2409_s12 + $0x18] sm:$0xff] }
 0x557   : > { %v1811_v30 = vpop.f32.mrf.mxu1 }
 0x559   : > { %v2315_v31 = vpop.f32.mrf.mxu1 }
 0x55d   : > { %1815 = vmatpush3.bf16.xpose.msra.mxu1 %v1354_v32 }
 0x564   : > { %1817 = vmatmul.mubr.msk.bf16.vlgmr.msra.gmra.mxu1 %vm595_vm3, %v1346_v37 }
 0x624   : > { %v1818_v39 = vpop.f32.mrf.mxu1 }
 0x625   : > { %v1410_v47 = vmul.f32 0.17677669, %v1818_v39 }
 0x626   : > { %v1393_v40 = vpop.f32.mrf.mxu1 }
 0x627   : > { %v1408_v41 = vmul.f32 0.17677669, %v1393_v40  ;;  %v1418_v55 = vadd.f32 %v1414_v51, %v1410_v47  ;;  %v1329_v40 = vld [vmem:[%s2406_s9] sm:$0xff] }
 0x628   : > { %v1819_v42 = vpop.f32.mrf.mxu1 }
 0x629   : > { %v1411_v43 = vmul.f32 0.17677669, %v1819_v42  ;;  %v1416_v44 = vadd.f32 %v1412_v14, %v1408_v41  ;;  %v1426_v56 = vsel %vm478_vm0, %v1418_v55, -inf  ;;  %v1330_v14 = vld [vmem:[%s2406_s9 + $0x8] sm:$0xff] }
 0x62a   : > { %v1396_v45 = vpop.f32.mrf.mxu1 }
 0x62b   : > { %v1409_v48 = vmul.f32 0.17677669, %v1396_v45  ;;  %v1420_v49 = vsel %vm478_vm0, %v1416_v44, -inf  ;;  %v1419_v50 = vadd.f32 %v1415_v16, %v1411_v43 }
 0x62c   : > { %1421 = vmax.xlane.f32.xlu1 %v1420_v49 }
 0x62d   : > { %v1417_v52 = vadd.f32 %v1413_v46, %v1409_v48  ;;  %v1429_v53 = vsel %vm478_vm0, %v1419_v50, -inf }
 0x62f   : > { %v1423_v54 = vsel %vm478_vm0, %v1417_v52, -inf }
 0x630   : > { %1430 = vmax.xlane.f32.xlu1 %v1429_v53  ;;  %1424 = vmax.xlane.f32.xlu0 %v1423_v54 }
 0x634   : > { %1427 = vmax.xlane.f32.xlu0 %v1426_v56 }
 0x641   : > { %1229 = vperm.xlu1 %1874, %v1191_v57  }
 0x64a   : > { %1224 = vperm.xlu0 %1873, %v1190_v58  }
 0x6b5   : > { %v1422_v59 = vpop.xlane.xlu1 %1421 }
 0x6b6   : > { %v1432_v0 = vsub.f32 %v1416_v44, %v1422_v59 }
 0x6b8   : > { %v1436_v5 = vmul.f32 1.442695, %v1432_v0 }
 0x6b9   : > { %v1431_v60 = vpop.xlane.xlu1 %1430  ;;  %v1425_v61 = vpop.xlane.xlu0 %1424 }
 0x6ba   : > { %v1435_v62 = vsub.f32 %v1419_v50, %v1431_v60  ;;  %v1433_v63 = vsub.f32 %v1417_v52, %v1425_v61  ;;  %v1935_v60 = vld [vmem:[%s2408_s11 + $0x8] sm:$0xff]  }
 0x6bc   : > { %v1442_v1 = vmul.f32 1.442695, %v1435_v62  ;;  %v1438_v3 = vmul.f32 1.442695, %v1433_v63 }
 0x6bd   : > { %v1428_v4 = vpop.xlane.xlu0 %1427  ;;  %v1230_v11 = vpop.permute.xlu1 %1229 }
 0x6be   : > { %1938 = vpow2.f32 %v1442_v1  ;;  %v1434_v2 = vsub.f32 %v1418_v55, %v1428_v4  ;;  %v1326_v12 = vadd.f32 %v1811_v30, %v1230_v11 }
 0x6bf   : > { %1940 = vpow2.f32 %v1438_v3 }
 0x6c0   : > { %v1440_v6 = vmul.f32 1.442695, %v1434_v2  ;;  %v1336_v19 = vadd.f32 %v1332_v13, %v1326_v12 }
 0x6c2   : > { %1942 = vpow2.f32 %v1440_v6 }
 0x6c3   : > { %1944 = vpow2.f32 %v1436_v5 }
 0x6c5   : > { %v1225_v18 = vpop.permute.xlu0 %1224 }
 0x6c6   : > { %v1323_v17 = vadd.f32 %v1810_v38, %v1225_v18 }
 0x6c8   : > { %v1335_v20 = vadd.f32 %v1331_v15, %v1323_v17 }
 0x6ca   : > { %v1467_v21 = vpack.c.bf16 %v1336_v19, %v1335_v20 }
 0x6cb   : > { %v1939_v8 = vpop.eup %1938 }
 0x6cc   : > { %1820 = vmatprep.subr.bf16.mxu0 %v1467_v21  ;;  %v1453_v7 = vsel %vm478_vm0, %v1939_v8, 0.0  ;;  %v1941_v33 = vpop.eup %1940 }
 0x6cd   : > { %1454 = vadd.xlane.f32.xlu1 %v1453_v7  ;;  %1821 = vmatpush3.bf16.msra.mxu0 %v1467_v21  ;;  %v1447_v24 = vsel %vm478_vm0, %v1941_v33, 0.0 }
 0x6cf   : > { %v1943_v22 = vpop.eup %1942 }
 0x6d0   : > { %v1450_v25 = vsel %vm478_vm0, %v1943_v22, 0.0  ;;  %v1945_v26 = vpop.eup %1944 }
 0x6d1   : > { %1448 = vadd.xlane.f32.xlu1 %v1447_v24  ;;  %1451 = vadd.xlane.f32.xlu0 %v1450_v25  ;;  %v1444_v27 = vsel %vm478_vm0, %v1945_v26, 0.0 }
 0x6d5   : > { %1445 = vadd.xlane.f32.xlu0 %v1444_v27 }
 0x6e2   : > { %1214 = vperm.xlu1 %1874, %v1188_v29  }
 0x6e6   : > { %1535 = vperm.xlu1 %1874, %v1529_v34  }
 0x6ea   : > { %1545 = vperm.xlu1 %1874, %v1531_v10  }
 0x6eb   : > { %1219 = vperm.xlu0 %1873, %v1189_v35  }
 0x6ef   : > { %1540 = vperm.xlu0 %1873, %v1530_v9  }
 0x6f3   : > { %1550 = vperm.xlu0 %1873, %v1532_v36  }
 0x756   : > { %v1455_v23 = vpop.xlane.xlu1 %1454 }
 0x75a   : > { %v1449_v32 = vpop.xlane.xlu1 %1448  ;;  %v1452_v37 = vpop.xlane.xlu0 %1451 }
 0x75b   : > { %1946 = vrcp.f32 %v1452_v37 }
 0x75c   : > { %1948 = vrcp.f32 %v1449_v32 }
 0x75d   : > { %1950 = vrcp.f32 %v1455_v23 }
 0x75e   : > { %v1446_v38 = vpop.xlane.xlu0 %1445  ;;  %v1215_v30 = vpop.permute.xlu1 %1214 }
 0x75f   : > { %1952 = vrcp.f32 %v1446_v38  ;;  %v1315_v39 = vadd.f32 %v2313_v28, %v1215_v30 }
 0x761   : > { %v1333_v43 = vadd.f32 %v1329_v40, %v1315_v39 }
 0x762   : > { %v1536_v61 = vpop.permute.xlu1 %1535 }
 0x766   : > { %v1220_v41 = vpop.permute.xlu0 %1219  ;;  %v1546_v63 = vpop.permute.xlu1 %1545 }
 0x767   : > { %v1318_v42 = vadd.f32 %v2315_v31, %v1220_v41  ;;  %v1934_v31 = vld [vmem:[%s2408_s11] sm:$0xff]  }
 0x768   : > { %v1947_v16 = vpop.eup %1946 }
 0x769   : > { %v1334_v44 = vadd.f32 %v1330_v14, %v1318_v42  ;;  %v1949_v45 = vpop.eup %1948  ;;  %v1462_v49 = vmul.f32 %v1947_v16, %v1943_v22 }
 0x76a   : > { %v1951_v46 = vpop.eup %1950  ;;  %v1461_v50 = vmul.f32 %v1949_v45, %v1941_v33  ;;  %v1541_v62 = vpop.permute.xlu0 %1540 }
 0x76b   : > { %v1466_v47 = vpack.c.bf16 %v1334_v44, %v1333_v43  ;;  %v1463_v51 = vmul.f32 %v1951_v46, %v1939_v8 }
 0x76c   : > { %v1953_v48 = vpop.eup %1952 }
 0x76d   : > { %1822 = vmatprep.subr.bf16.mxu0 %v1466_v47  ;;  %v1460_v28 = vmul.f32 %v1953_v48, %v1945_v26  ;;  %v1465_v53 = vpack.c.bf16 %v1463_v51, %v1462_v49 }
 0x76e   : > { %1823 = vmatpush3.bf16.msra.mxu0 %v1466_v47  ;;  %v1551_v2 = vpop.permute.xlu0 %1550 }
 0x76f   : > { %v1464_v52 = vpack.c.bf16 %v1461_v50, %v1460_v28 }
 0x771   : > { %1824 = vmatprep.mubr.msk.bf16.mxu0 %vm478_vm0, %v1464_v52 }
 0x772   : > { %1825 = vmatmul.mubr.msk.bf16.vlgmr.msra.gmra.mxu0 %vm478_vm0, %v1465_v53 }
 0x773   : > { %1832 = vmatprep.mubr.msk.bf16.mxu0 %vm478_vm0, %v1934_v31 }
 0x832   : > { %v1826_v54 = vpop.f32.mrf.mxu0 }
 0x834   : > { %v1508_v55 = vpop.f32.mrf.mxu0 }
 0x836   : > { %v1827_v56 = vpop.f32.mrf.mxu0 }
 0x837   : > { %v1528_v57 = vpack.c.bf16 %v1827_v56, %v1826_v54 }
 0x838   : > { %v1511_v58 = vpop.f32.mrf.mxu0 }
 0x839   : > { %v1527_v59 = vpack.c.bf16 %v1511_v58, %v1508_v55  ;;  %1828 = vmatprep.subr.bf16.mxu0 %v1528_v57 }
 0x83a   : > { %1829 = vmatpush3.bf16.msra.mxu0 %v1528_v57 }
 0x83b   : > { %1830 = vmatprep.subr.bf16.mxu0 %v1527_v59 }
 0x83e   : > { %1831 = vmatpush3.bf16.msra.mxu0 %v1527_v59 }
 0x841   : > { %1833 = vmatmul.mubr.msk.bf16.vlgmr.msra.gmra.mxu0 %vm478_vm0, %v1935_v60 }
 0x901   : > { %v1834_v0 = vpop.f32.mrf.mxu0 }
 0x902   : > { %v1612_v1 = vadd.f32 %v1834_v0, %v1546_v63 }
 0x903   : > { %v1603_v3 = vpop.f32.mrf.mxu0 }
 0x904   : > { %1620 = vst.msk [vmem:[%s442_s26 + $0x10] sm:$0xff] %vm595_vm3, %v1612_v1  ;;  %v1604_v4 = vadd.f32 %v1603_v3, %v1536_v61 }
 0x905   : > { %v1835_v5 = vpop.f32.mrf.mxu0 }
 0x906   : > { %1618 = vst.msk [vmem:[%s442_s26] sm:$0xff] %vm595_vm3, %v1604_v4  ;;  %v1615_v6 = vadd.f32 %v1835_v5, %v1551_v2 }
 0x907   : > { %v1606_v11 = vpop.f32.mrf.mxu0 }
 0x908   : > { %1621 = vst.msk [vmem:[%s442_s26 + $0x18] sm:$0xff] %vm595_vm3, %v1615_v6  ;;  %v1607_v12 = vadd.f32 %v1606_v11, %v1541_v62 }
 0x90a   : > { %1619 = vst.msk [vmem:[%s442_s26 + $0x8] sm:$0xff] %vm595_vm3, %v1607_v12 }
 0x90b PF: > { %s25_s27 = sadd.s32 1, %s1960_s27  }
 0x90c   : > { %p22_p4 = scmp.ge.s32.totalorder %s25_s27, 4  }
 0x90e   :  { %24 = sbr.rel (!%p22_p4) target bundleno = 3 (0x3), region = 102 }

</bundles_post_ra>
